<compile_context>
chip_gen: v6e
topology: v6e:2x2x1
jax: 0.10.0
libtpu: 0.0.40
codegen_flags: <defaults>
</compile_context>

<pallas_src>
import functools

import jax
import jax.numpy as jnp
from jax.experimental import pallas as pl
from jax.experimental.pallas import tpu as pltpu

_MXU_DTYPE = jnp.bfloat16     # MXU operand dtype (f32 accumulation everywhere)
_ACT_DTYPE = jnp.bfloat16     # inter-pass activations stored in HBM
_BN_EPS = 1e-5


# --------------------------------------------------------------------------
# TPU-generation-aware configuration
# --------------------------------------------------------------------------
def _tpu_config():
    """Returns (vmem_limit_bytes, preferred_patch_dtype)."""
    kind = ""
    try:
        kind = jax.devices()[0].device_kind.lower()
    except Exception:
        pass
    vmem_cap = None
    try:
        vmem_cap = int(pltpu.get_tpu_info().vmem_capacity_bytes)
    except Exception:
        vmem_cap = None
    if vmem_cap is None:
        vmem_cap = (64 if "v7" in kind else 128) * 1024 * 1024
    # leave headroom for Mosaic-internal scratch; ~48 MiB on v7x, ~110 MiB v5e/v6e
    vmem_limit = int(max(32 * 1024 * 1024,
                         min(vmem_cap - 16 * 1024 * 1024, 110 * 1024 * 1024)))
    # v5e-and-older VPUs have no native bf16: build the im2col patch in f32 and
    # only cast the finished patch at the matmul.  v6e/v7x build it in bf16.
    old_gen = any(t in kind for t in ("v2", "v3", "v4", "v5"))
    patch_dtype = jnp.float32 if old_gen else _MXU_DTYPE
    return vmem_limit, patch_dtype


def _pad_to(v, mult):
    return ((v + mult - 1) // mult) * mult


def _pick_pixel_tile(hw):
    """Large lane-dense tile for the elementwise pass (review: 128 is too small)."""
    if hw <= 4096:
        return hw
    for tp in (4096, 2048, 1024, 512, 256, 128):
        if hw % tp == 0:
            return tp
    return hw


def _pick_batch_tile(n, per_image_bytes, budget):
    bt = 1
    for cand in range(1, min(n, 8) + 1):
        if n % cand == 0 and cand * per_image_bytes <= budget:
            bt = cand
    return bt


# --------------------------------------------------------------------------
# In-kernel helpers
# --------------------------------------------------------------------------
def _tap_pieces(xflat, H, W, dil):
    """9 shifted / zero-padded copies of a (C, H*W) image, one per 3x3 tap.

    Piece t = ky*3+kx holds x shifted by ((ky-1)*dil, (kx-1)*dil) with zeros
    outside the image, so conv3x3(dilation=dil, padding=dil) = sum_t W_t @ piece_t.
    Built from static lane-slices of a row-padded flat image plus column masks
    (no per-tap reshapes / relayouts).
    """
    C, HW = xflat.shape
    dt = xflat.dtype
    pad = jnp.zeros((C, dil * W + dil), dt)
    xpf = jnp.concatenate([pad, xflat, pad], axis=1)        # (C, HW + 2*(dil*W+dil))
    # column index of every flattened pixel (0..W-1 repeating), lanes only.
    xcol = jnp.tile(jax.lax.broadcasted_iota(jnp.int32, (1, W), 1), (1, H))
    zero = jnp.zeros((), dt)
    pieces = []
    for ky in range(3):
        for kx in range(3):
            start = ky * dil * W + kx * dil                 # static lane offset
            piece = xpf[:, start:start + HW]                # (C, HW)
            cshift = (kx - 1) * dil
            if cshift < 0:                                  # left taps: cols < dil invalid
                piece = jnp.where(xcol >= -cshift, piece, zero)
            elif cshift > 0:                                # right taps: cols >= W-dil invalid
                piece = jnp.where(xcol < W - cshift, piece, zero)
            pieces.append(piece)
    return pieces


def _dilated_conv_multi(lhs, imgs, H, W, dil, tap_accum):
    """Dilated 3x3 conv of a list of images on the MXU.

    lhs : (M, 9*C) weights (bf16), row-block order [(ky,kx) outer, ci inner].
    imgs: list of (C, H*W) arrays already in the patch-build dtype.
    Returns (M, len(imgs)*H*W) f32.
    """
    C = imgs[0].shape[0]
    if tap_accum:
        # Never materialize the (9C, HW) im2col matrix: 9 per-tap matmuls into
        # one f32 accumulator (same MAC count; v7x MRB accumulates in place).
        cols = []
        for x in imgs:
            acc = None
            for t, piece in enumerate(_tap_pieces(x, H, W, dil)):
                part = jnp.dot(lhs[:, t * C:(t + 1) * C],
                               piece.astype(lhs.dtype),
                               preferred_element_type=jnp.float32)
                acc = part if acc is None else acc + part
            cols.append(acc)
        return cols[0] if len(cols) == 1 else jnp.concatenate(cols, axis=1)
    # One matmul with K = 9*C; multiple images concatenated along lanes so a
    # single weight push serves a wide RHS.
    patches = [jnp.concatenate(_tap_pieces(x, H, W, dil), axis=0) for x in imgs]
    patch = patches[0] if len(patches) == 1 else jnp.concatenate(patches, axis=1)
    return jnp.dot(lhs, patch.astype(lhs.dtype), preferred_element_type=jnp.float32)


def _stats_cols(y):
    """Per-channel (sum, sumsq) over all lanes of the f32 accumulator."""
    return [jnp.sum(y, axis=1, keepdims=True),
            jnp.sum(y * y, axis=1, keepdims=True)]


# --------------------------------------------------------------------------
# Pass 1: conv1 (dilated 3x3) [+ fused 1x1 projection] + BN partial sums
# --------------------------------------------------------------------------
def _conv1_kernel(x_ref, lhs_ref, *out_refs, H, W, dil, bt, cout, has_proj,
                  tap_accum, patch_dtype):
    if has_proj:
        y1_ref, ysc_ref, st_ref = out_refs
    else:
        y1_ref, st_ref = out_refs
    HW = H * W
    lhs = lhs_ref[...]
    imgs = [x_ref[b].astype(patch_dtype) for b in range(bt)]
    out = _dilated_conv_multi(lhs, imgs, H, W, dil, tap_accum)   # (M, bt*HW) f32

    conv1 = out[:cout]
    for b in range(bt):
        y1_ref[b] = conv1[:, b * HW:(b + 1) * HW].astype(y1_ref.dtype)
    if has_proj:
        sc = out[cout:]
        for b in range(bt):
            ysc_ref[b] = sc[:, b * HW:(b + 1) * HW].astype(ysc_ref.dtype)
        # packed per-step BN partials: [sum1, sumsq1, sum_sc, sumsq_sc]
        st_ref[0] = jnp.concatenate(_stats_cols(conv1) + _stats_cols(sc), axis=1)
    else:
        st_ref[0] = jnp.concatenate(_stats_cols(conv1), axis=1)


# --------------------------------------------------------------------------
# Pass 2: BN1 affine + ReLU + conv2 (dilated 3x3) + BN partial sums
# --------------------------------------------------------------------------
def _bn_relu_conv2_kernel(y1_ref, s1_ref, b1_ref, w2_ref, y2_ref, st_ref, *,
                          H, W, dil, bt, tap_accum, patch_dtype):
    HW = H * W
    s1 = s1_ref[...]
    b1 = b1_ref[...]
    w2 = w2_ref[...]
    imgs = []
    for b in range(bt):
        h = y1_ref[b].astype(jnp.float32)                    # (Cout, HW)
        a = jnp.maximum(h * s1 + b1, 0.0)                    # BN1 (batch stats) + ReLU, f32
        imgs.append(a.astype(patch_dtype))
    conv2 = _dilated_conv_multi(w2, imgs, H, W, dil, tap_accum)  # (Cout, bt*HW) f32
    for b in range(bt):
        y2_ref[b] = conv2[:, b * HW:(b + 1) * HW].astype(y2_ref.dtype)
    st_ref[0] = jnp.concatenate(_stats_cols(conv2), axis=1)


# --------------------------------------------------------------------------
# Pass 3: BN2 + BN_sc(or identity) + residual add + ReLU (elementwise)
# --------------------------------------------------------------------------
def _bn_add_relu_kernel(y2_ref, sc_ref, s2_ref, b2_ref, ssc_ref, bsc_ref, o_ref):
    y2 = y2_ref[...].astype(jnp.float32)
    sc = sc_ref[...].astype(jnp.float32)
    out = (y2 * s2_ref[...][None] + b2_ref[...][None]
           + sc * ssc_ref[...][None] + bsc_ref[...][None])
    o_ref[...] = jnp.maximum(out, 0.0)


# --------------------------------------------------------------------------
# BN finalize (tiny per-channel reduction, plain XLA glue)
# --------------------------------------------------------------------------
def _bn_scale_shift(sum_c, sumsq_c, gamma, beta, count, eps=_BN_EPS):
    # NOTE: single-pass E[x^2]-E[x]^2 in f32 (stats come from the f32 MXU
    # accumulator); fine for BN-scale activations, use two-pass if inputs are
    # huge / far from zero-centered.
    mean = sum_c / count
    var = jnp.maximum(sumsq_c / count - mean * mean, 0.0)
    scale = gamma * jax.lax.rsqrt(var + eps)
    shift = beta - mean * scale
    return (scale.reshape(-1, 1).astype(jnp.float32),
            shift.reshape(-1, 1).astype(jnp.float32))


# --------------------------------------------------------------------------
# Forward
# --------------------------------------------------------------------------
@functools.partial(jax.jit, static_argnames=("dilation", "tap_accum"))
def dilated_res_block_forward(x, params, dilation=2, tap_accum=None):
    """x: (N, Cin, H, W) f32 (PyTorch NCHW).  Returns (N, Cout, H, W) f32."""
    N, Cin, H, W = x.shape
    Cout = params["w1"].shape[0]
    HW = H * W
    count = float(N * H * W)
    has_proj = "wsc" in params

    vmem_limit, pref_patch_dtype = _tpu_config()

    # channel padding to whole (8-row) sublane tiles: aligned im2col concat + MXU K.
    Cin_p = _pad_to(Cin, 8)
    Cout_p = _pad_to(Cout, 8)

    x = x.astype(jnp.float32)
    if Cin_p != Cin:
        x = jnp.pad(x, ((0, 0), (0, Cin_p - Cin), (0, 0), (0, 0)))
    x_flat = x.reshape(N, Cin_p, HW)                         # NCHW kept native

    def pad_w(w, co, ci):
        return jnp.pad(w, ((0, co - w.shape[0]), (0, ci - w.shape[1]), (0, 0), (0, 0)))

    # (Cout, Cin, 3, 3) -> (Cout, 9*Cin), row-block order [(ky,kx) outer, ci inner].
    w1 = pad_w(params["w1"], Cout_p, Cin_p)
    w2 = pad_w(params["w2"], Cout_p, Cout_p)
    w1m = jnp.transpose(w1, (0, 2, 3, 1)).reshape(Cout_p, 9 * Cin_p)
    w2m = jnp.transpose(w2, (0, 2, 3, 1)).reshape(Cout_p, 9 * Cout_p).astype(_MXU_DTYPE)

    if has_proj:
        # Fuse the 1x1 projection into the conv1 matmul: its weights live only
        # in the centre-tap (ky=1,kx=1) K-columns of Cout_p extra LHS rows.
        wsc = pad_w(params["wsc"], Cout_p, Cin_p).reshape(Cout_p, Cin_p)
        wsc_rows = jnp.zeros((Cout_p, 9 * Cin_p), jnp.float32)
        wsc_rows = wsc_rows.at[:, 4 * Cin_p:5 * Cin_p].set(wsc)
        lhs1 = jnp.concatenate([w1m, wsc_rows], axis=0).astype(_MXU_DTYPE)
    else:
        lhs1 = w1m.astype(_MXU_DTYPE)
    lhs_rows = lhs1.shape[0]

    def pad_c(v, fill):
        v = v.astype(jnp.float32)
        if Cout_p == Cout:
            return v
        return jnp.concatenate([v, jnp.full((Cout_p - Cout,), fill, jnp.float32)])

    gamma1, beta1 = pad_c(params["gamma1"], 1.0), pad_c(params["beta1"], 0.0)
    gamma2, beta2 = pad_c(params["gamma2"], 1.0), pad_c(params["beta2"], 0.0)

    # ------ static sizing decisions -----------------------------------------
    def patch_dt(c):
        # bf16-built patches need whole bf16 sublane tiles (16 rows) per channel
        # block to concatenate cleanly; otherwise build f32 and cast at the matmul
        # (always the right order on v5e-class VPUs with no native bf16).
        return pref_patch_dtype if (pref_patch_dtype == jnp.bfloat16 and c % 16 == 0) \
            else jnp.float32

    pdt1, pdt2 = patch_dt(Cin_p), patch_dt(Cout_p)
    Cmax = max(Cin_p, Cout_p)
    pbytes = max(jnp.dtype(pdt1).itemsize, jnp.dtype(pdt2).itemsize)
    if tap_accum is None:
        # big feature maps (esp. under v7x's 64 MiB VMEM): never materialize im2col.
        tap_accum = 9 * Cmax * HW * pbytes > 6 * 1024 * 1024
    per_image = HW * (4 * Cmax                                     # f32 input / activation
                      + (pbytes * Cmax if tap_accum else pbytes * 9 * Cmax)  # patch temp
                      + 4 * lhs_rows                               # f32 MXU accumulator
                      + 2 * 2 * Cout_p)                            # bf16 activation stores
    bt = _pick_batch_tile(N, 2 * per_image, vmem_limit // 2)
    nb = N // bt

    cp = pltpu.CompilerParams(dimension_semantics=("parallel",),
                              vmem_limit_bytes=vmem_limit)

    # ------ pass 1: conv1 [+ fused projection] + packed BN partials ---------
    st1_cols = 4 if has_proj else 2
    out_shapes1 = [jax.ShapeDtypeStruct((N, Cout_p, HW), _ACT_DTYPE)]
    out_specs1 = [pl.BlockSpec((bt, Cout_p, HW), lambda n: (n, 0, 0))]
    if has_proj:
        out_shapes1.append(jax.ShapeDtypeStruct((N, Cout_p, HW), _ACT_DTYPE))
        out_specs1.append(pl.BlockSpec((bt, Cout_p, HW), lambda n: (n, 0, 0)))
    out_shapes1.append(jax.ShapeDtypeStruct((nb, Cout_p, st1_cols), jnp.float32))
    out_specs1.append(pl.BlockSpec((1, Cout_p, st1_cols), lambda n: (n, 0, 0)))

    flops1 = 2 * N * HW * lhs_rows * 9 * Cin_p
    bytes1 = (4 * N * Cin_p * HW + 2 * N * Cout_p * HW * (2 if has_proj else 1)
              + 4 * nb * Cout_p * st1_cols + 2 * lhs_rows * 9 * Cin_p)

    res1 = pl.pallas_call(
        functools.partial(_conv1_kernel, H=H, W=W, dil=dilation, bt=bt,
                          cout=Cout_p, has_proj=has_proj,
                          tap_accum=tap_accum, patch_dtype=pdt1),
        grid=(nb,),
        in_specs=[pl.BlockSpec((bt, Cin_p, HW), lambda n: (n, 0, 0)),
                  pl.BlockSpec((lhs_rows, 9 * Cin_p), lambda n: (0, 0))],
        out_specs=out_specs1,
        out_shape=out_shapes1,
        compiler_params=cp,
        cost_estimate=pl.CostEstimate(flops=flops1, transcendentals=0,
                                      bytes_accessed=bytes1),
    )(x_flat, lhs1)
    if has_proj:
        y1, ysc, st1 = res1
    else:
        y1, st1 = res1

    tot1 = jnp.sum(st1, axis=0)                              # (Cout_p, st1_cols)
    s1, b1 = _bn_scale_shift(tot1[:, 0], tot1[:, 1], gamma1, beta1, count)

    # ------ pass 2: BN1+ReLU (fused) -> conv2 + BN partials ------------------
    flops2 = 2 * N * HW * Cout_p * 9 * Cout_p + 3 * N * Cout_p * HW
    bytes2 = (2 * 2 * N * Cout_p * HW + 4 * nb * Cout_p * 2
              + 2 * Cout_p * 9 * Cout_p + 8 * Cout_p)
    y2, st2 = pl.pallas_call(
        functools.partial(_bn_relu_conv2_kernel, H=H, W=W, dil=dilation, bt=bt,
                          tap_accum=tap_accum, patch_dtype=pdt2),
        grid=(nb,),
        in_specs=[pl.BlockSpec((bt, Cout_p, HW), lambda n: (n, 0, 0)),
                  pl.BlockSpec((Cout_p, 1), lambda n: (0, 0)),
                  pl.BlockSpec((Cout_p, 1), lambda n: (0, 0)),
                  pl.BlockSpec((Cout_p, 9 * Cout_p), lambda n: (0, 0))],
        out_specs=[pl.BlockSpec((bt, Cout_p, HW), lambda n: (n, 0, 0)),
                   pl.BlockSpec((1, Cout_p, 2), lambda n: (n, 0, 0))],
        out_shape=[jax.ShapeDtypeStruct((N, Cout_p, HW), _ACT_DTYPE),
                   jax.ShapeDtypeStruct((nb, Cout_p, 2), jnp.float32)],
        compiler_params=cp,
        cost_estimate=pl.CostEstimate(flops=flops2, transcendentals=0,
                                      bytes_accessed=bytes2),
    )(y1, s1, b1, w2m)

    tot2 = jnp.sum(st2, axis=0)
    s2, b2 = _bn_scale_shift(tot2[:, 0], tot2[:, 1], gamma2, beta2, count)
    if has_proj:
        ssc, bsc = _bn_scale_shift(tot1[:, 2], tot1[:, 3],
                                   pad_c(params["gamma_sc"], 1.0),
                                   pad_c(params["beta_sc"], 0.0), count)
        identity = ysc                                        # bf16
    else:
        identity = x_flat                                     # f32, Cin_p == Cout_p
        ssc = jnp.ones((Cout_p, 1), jnp.float32)
        bsc = jnp.zeros((Cout_p, 1), jnp.float32)

    # ------ pass 3: BN2 + BN_sc + residual add + ReLU (large lane tiles) -----
    TP = _pick_pixel_tile(HW)
    flops3 = 6 * N * Cout_p * HW
    bytes3 = (2 + identity.dtype.itemsize + 4) * N * Cout_p * HW
    out_flat = pl.pallas_call(
        _bn_add_relu_kernel,
        grid=(nb, HW // TP),
        in_specs=[pl.BlockSpec((bt, Cout_p, TP), lambda n, p: (n, 0, p)),
                  pl.BlockSpec((bt, Cout_p, TP), lambda n, p: (n, 0, p)),
                  pl.BlockSpec((Cout_p, 1), lambda n, p: (0, 0)),
                  pl.BlockSpec((Cout_p, 1), lambda n, p: (0, 0)),
                  pl.BlockSpec((Cout_p, 1), lambda n, p: (0, 0)),
                  pl.BlockSpec((Cout_p, 1), lambda n, p: (0, 0))],
        out_specs=pl.BlockSpec((bt, Cout_p, TP), lambda n, p: (n, 0, p)),
        out_shape=jax.ShapeDtypeStruct((N, Cout_p, HW), jnp.float32),
        compiler_params=pltpu.CompilerParams(
            dimension_semantics=("parallel", "parallel"),
            vmem_limit_bytes=vmem_limit),
        cost_estimate=pl.CostEstimate(flops=flops3, transcendentals=0,
                                      bytes_accessed=bytes3),
    )(y2, identity, s2, b2, ssc, bsc)

    out = out_flat.reshape(N, Cout_p, H, W)
    if Cout_p != Cout:
        out = out[:, :Cout]
    return out


# --------------------------------------------------------------------------
# Reference (pure JAX) + parameter init
# --------------------------------------------------------------------------
def _reference_forward(x, params, dilation):
    def conv(h, w, dil):
        return jax.lax.conv_general_dilated(
            h, w, window_strides=(1, 1), padding=((dil, dil), (dil, dil)),
            rhs_dilation=(dil, dil), dimension_numbers=("NCHW", "OIHW", "NCHW"))

    def bn(h, gamma, beta):
        mean = jnp.mean(h, axis=(0, 2, 3), keepdims=True)
        var = jnp.mean(jnp.square(h - mean), axis=(0, 2, 3), keepdims=True)
        hn = (h - mean) * jax.lax.rsqrt(var + _BN_EPS)
        return gamma.reshape(1, -1, 1, 1) * hn + beta.reshape(1, -1, 1, 1)

    if "wsc" in params:
        sc = jax.lax.conv_general_dilated(
            x, params["wsc"], (1, 1), ((0, 0), (0, 0)),
            dimension_numbers=("NCHW", "OIHW", "NCHW"))
        identity = bn(sc, params["gamma_sc"], params["beta_sc"])
    else:
        identity = x
    out = jax.nn.relu(bn(conv(x, params["w1"], dilation), params["gamma1"], params["beta1"]))
    out = bn(conv(out, params["w2"], dilation), params["gamma2"], params["beta2"])
    return jax.nn.relu(out + identity)


def init_params(key, in_ch, out_ch):
    """PyTorch-module-shaped parameters: conv weights (no bias), BN gamma=1 beta=0."""
    ks = jax.random.split(key, 3)
    s = 0.1
    p = {
        "w1": s * jax.random.normal(ks[0], (out_ch, in_ch, 3, 3), jnp.float32),
        "gamma1": jnp.ones((out_ch,), jnp.float32),
        "beta1": jnp.zeros((out_ch,), jnp.float32),
        "w2": s * jax.random.normal(ks[1], (out_ch, out_ch, 3, 3), jnp.float32),
        "gamma2": jnp.ones((out_ch,), jnp.float32),
        "beta2": jnp.zeros((out_ch,), jnp.float32),
    }
    if in_ch != out_ch:
        p["wsc"] = s * jax.random.normal(ks[2], (out_ch, in_ch, 1, 1), jnp.float32)
        p["gamma_sc"] = jnp.ones((out_ch,), jnp.float32)
        p["beta_sc"] = jnp.zeros((out_ch,), jnp.float32)
    return p


if __name__ == "__main__":
    key = jax.random.PRNGKey(0)
    k_x, k_p1, k_p2 = jax.random.split(key, 3)

    N, Cin, H, W = 2, 4, 16, 16
    Cout, dilation = 8, 2

    # projection-shortcut block (Cin != Cout)
    x = jax.random.normal(k_x, (N, Cin, H, W), jnp.float32)
    params = init_params(k_p1, Cin, Cout)
    out = jax.block_until_ready(dilated_res_block_forward(x, params, dilation=dilation))
    assert out.shape == (N, Cout, H, W)
    assert bool(jnp.all(jnp.isfinite(out)))
    assert bool(jnp.all(out >= 0.0))                         # final ReLU
    ref = _reference_forward(x, params, dilation)
    assert float(jnp.max(jnp.abs(out - ref))) < 0.1          # bf16 MXU/storage tolerance

    # identity-shortcut block (Cin == Cout): exercises the specialized pass 1
    x2 = jax.random.normal(k_x, (N, Cout, H, W), jnp.float32)
    params_id = init_params(k_p2, Cout, Cout)
    out2 = jax.block_until_ready(dilated_res_block_forward(x2, params_id, dilation=dilation))
    ref2 = _reference_forward(x2, params_id, dilation)
    assert float(jnp.max(jnp.abs(out2 - ref2))) < 0.1

    # tap-accumulation path (chosen automatically for large C*HW, e.g. on v7x)
    out3 = jax.block_until_ready(
        dilated_res_block_forward(x, params, dilation=dilation, tap_accum=True))
    assert float(jnp.max(jnp.abs(out3 - ref))) < 0.1

    print("KERNEL_OK")
</pallas_src>

<mosaic_0001>
module attributes {stable_mosaic.version = 11 : i64} {
  func.func @_conv1_kernel(%arg0: i32, %arg1: memref<2x8x256xf32, #tpu.memory_space<vmem>>, %arg2: memref<16x72xbf16, #tpu.memory_space<vmem>>, %arg3: memref<2x8x256xbf16, #tpu.memory_space<vmem>>, %arg4: memref<2x8x256xbf16, #tpu.memory_space<vmem>>, %arg5: memref<1x8x4xf32, #tpu.memory_space<vmem>>) attributes {dimension_semantics = [#tpu.dimension_semantics<parallel>], iteration_bounds = array<i64: 1>, scalar_prefetch = 0 : i64, scratch_operands = 0 : i64, tpu.core_type = #tpu.core_type<tc>, window_params = [{transform_indices = @transform_0, window_bounds = array<i64: 2, 8, 256>}, {pipeline_mode = #tpu.pipeline_mode<synchronous>, transform_indices = @transform_1, window_bounds = array<i64: 16, 72>}, {transform_indices = @transform_2, window_bounds = array<i64: 2, 8, 256>}, {transform_indices = @transform_3, window_bounds = array<i64: 2, 8, 256>}, {transform_indices = @transform_4, window_bounds = array<i64: 1, 8, 4>}]} {
    %c0 = arith.constant 0 : index
    %c0_0 = arith.constant 0 : index
    %0 = vector.load %arg2[%c0, %c0_0] : memref<16x72xbf16, #tpu.memory_space<vmem>>, vector<16x72xbf16>
    %c0_1 = arith.constant 0 : index
    %c0_2 = arith.constant 0 : index
    %c0_3 = arith.constant 0 : index
    %1 = vector.load %arg1[%c0_1, %c0_2, %c0_3] : memref<2x8x256xf32, #tpu.memory_space<vmem>>, vector<1x8x256xf32>
    %2 = vector.shape_cast %1 : vector<1x8x256xf32> to vector<8x256xf32>
    %c1 = arith.constant 1 : index
    %c0_4 = arith.constant 0 : index
    %c0_5 = arith.constant 0 : index
    %3 = vector.load %arg1[%c1, %c0_4, %c0_5] : memref<2x8x256xf32, #tpu.memory_space<vmem>>, vector<1x8x256xf32>
    %4 = vector.shape_cast %3 : vector<1x8x256xf32> to vector<8x256xf32>
    %cst = arith.constant 0.000000e+00 : f32
    %5 = vector.broadcast %cst : f32 to vector<8x34xf32>
    %6 = tpu.concatenate %5, %2, %5 in 1 : vector<8x34xf32>, vector<8x256xf32>, vector<8x34xf32> -> vector<8x324xf32>
    %7 = tpu.iota {dimensions = array<i32: 1>} : vector<1x16xi32>
    %8 = tpu.concatenate %7, %7, %7, %7, %7, %7, %7, %7, %7, %7, %7, %7, %7, %7, %7, %7 in 1 : vector<1x16xi32>, vector<1x16xi32>, vector<1x16xi32>, vector<1x16xi32>, vector<1x16xi32>, vector<1x16xi32>, vector<1x16xi32>, vector<1x16xi32>, vector<1x16xi32>, vector<1x16xi32>, vector<1x16xi32>, vector<1x16xi32>, vector<1x16xi32>, vector<1x16xi32>, vector<1x16xi32>, vector<1x16xi32> -> vector<1x256xi32>
    %9 = vector.extract_strided_slice %6 {offsets = [0, 0], sizes = [8, 256], strides = [1, 1]} : vector<8x324xf32> to vector<8x256xf32>
    %c2_i32 = arith.constant 2 : i32
    %10 = vector.broadcast %c2_i32 : i32 to vector<1x256xi32>
    %11 = arith.cmpi sge, %8, %10 : vector<1x256xi32>
    %cst_6 = arith.constant 0.000000e+00 : f32
    %12 = vector.shape_cast %11 : vector<1x256xi1> to vector<1x256xi1>
    %13 = vector.broadcast %12 : vector<1x256xi1> to vector<8x256xi1>
    %14 = vector.broadcast %cst_6 : f32 to vector<8x256xf32>
    %15 = arith.select %13, %9, %14 : vector<8x256xi1>, vector<8x256xf32>
    %16 = vector.extract_strided_slice %6 {offsets = [0, 2], sizes = [8, 256], strides = [1, 1]} : vector<8x324xf32> to vector<8x256xf32>
    %17 = vector.extract_strided_slice %6 {offsets = [0, 4], sizes = [8, 256], strides = [1, 1]} : vector<8x324xf32> to vector<8x256xf32>
    %c14_i32 = arith.constant 14 : i32
    %18 = vector.broadcast %c14_i32 : i32 to vector<1x256xi32>
    %19 = arith.cmpi slt, %8, %18 : vector<1x256xi32>
    %cst_7 = arith.constant 0.000000e+00 : f32
    %20 = vector.shape_cast %19 : vector<1x256xi1> to vector<1x256xi1>
    %21 = vector.broadcast %20 : vector<1x256xi1> to vector<8x256xi1>
    %22 = vector.broadcast %cst_7 : f32 to vector<8x256xf32>
    %23 = arith.select %21, %17, %22 : vector<8x256xi1>, vector<8x256xf32>
    %24 = vector.extract_strided_slice %6 {offsets = [0, 32], sizes = [8, 256], strides = [1, 1]} : vector<8x324xf32> to vector<8x256xf32>
    %c2_i32_8 = arith.constant 2 : i32
    %25 = vector.broadcast %c2_i32_8 : i32 to vector<1x256xi32>
    %26 = arith.cmpi sge, %8, %25 : vector<1x256xi32>
    %cst_9 = arith.constant 0.000000e+00 : f32
    %27 = vector.shape_cast %26 : vector<1x256xi1> to vector<1x256xi1>
    %28 = vector.broadcast %27 : vector<1x256xi1> to vector<8x256xi1>
    %29 = vector.broadcast %cst_9 : f32 to vector<8x256xf32>
    %30 = arith.select %28, %24, %29 : vector<8x256xi1>, vector<8x256xf32>
    %31 = vector.extract_strided_slice %6 {offsets = [0, 34], sizes = [8, 256], strides = [1, 1]} : vector<8x324xf32> to vector<8x256xf32>
    %32 = vector.extract_strided_slice %6 {offsets = [0, 36], sizes = [8, 256], strides = [1, 1]} : vector<8x324xf32> to vector<8x256xf32>
    %c14_i32_10 = arith.constant 14 : i32
    %33 = vector.broadcast %c14_i32_10 : i32 to vector<1x256xi32>
    %34 = arith.cmpi slt, %8, %33 : vector<1x256xi32>
    %cst_11 = arith.constant 0.000000e+00 : f32
    %35 = vector.shape_cast %34 : vector<1x256xi1> to vector<1x256xi1>
    %36 = vector.broadcast %35 : vector<1x256xi1> to vector<8x256xi1>
    %37 = vector.broadcast %cst_11 : f32 to vector<8x256xf32>
    %38 = arith.select %36, %32, %37 : vector<8x256xi1>, vector<8x256xf32>
    %39 = vector.extract_strided_slice %6 {offsets = [0, 64], sizes = [8, 256], strides = [1, 1]} : vector<8x324xf32> to vector<8x256xf32>
    %c2_i32_12 = arith.constant 2 : i32
    %40 = vector.broadcast %c2_i32_12 : i32 to vector<1x256xi32>
    %41 = arith.cmpi sge, %8, %40 : vector<1x256xi32>
    %cst_13 = arith.constant 0.000000e+00 : f32
    %42 = vector.shape_cast %41 : vector<1x256xi1> to vector<1x256xi1>
    %43 = vector.broadcast %42 : vector<1x256xi1> to vector<8x256xi1>
    %44 = vector.broadcast %cst_13 : f32 to vector<8x256xf32>
    %45 = arith.select %43, %39, %44 : vector<8x256xi1>, vector<8x256xf32>
    %46 = vector.extract_strided_slice %6 {offsets = [0, 66], sizes = [8, 256], strides = [1, 1]} : vector<8x324xf32> to vector<8x256xf32>
    %47 = vector.extract_strided_slice %6 {offsets = [0, 68], sizes = [8, 256], strides = [1, 1]} : vector<8x324xf32> to vector<8x256xf32>
    %c14_i32_14 = arith.constant 14 : i32
    %48 = vector.broadcast %c14_i32_14 : i32 to vector<1x256xi32>
    %49 = arith.cmpi slt, %8, %48 : vector<1x256xi32>
    %cst_15 = arith.constant 0.000000e+00 : f32
    %50 = vector.shape_cast %49 : vector<1x256xi1> to vector<1x256xi1>
    %51 = vector.broadcast %50 : vector<1x256xi1> to vector<8x256xi1>
    %52 = vector.broadcast %cst_15 : f32 to vector<8x256xf32>
    %53 = arith.select %51, %47, %52 : vector<8x256xi1>, vector<8x256xf32>
    %54 = tpu.concatenate %15, %16, %23, %30, %31, %38, %45, %46, %53 in 0 : vector<8x256xf32>, vector<8x256xf32>, vector<8x256xf32>, vector<8x256xf32>, vector<8x256xf32>, vector<8x256xf32>, vector<8x256xf32>, vector<8x256xf32>, vector<8x256xf32> -> vector<72x256xf32>
    %cst_16 = arith.constant 0.000000e+00 : f32
    %55 = vector.broadcast %cst_16 : f32 to vector<8x34xf32>
    %56 = tpu.concatenate %55, %4, %55 in 1 : vector<8x34xf32>, vector<8x256xf32>, vector<8x34xf32> -> vector<8x324xf32>
    %57 = tpu.iota {dimensions = array<i32: 1>} : vector<1x16xi32>
    %58 = tpu.concatenate %57, %57, %57, %57, %57, %57, %57, %57, %57, %57, %57, %57, %57, %57, %57, %57 in 1 : vector<1x16xi32>, vector<1x16xi32>, vector<1x16xi32>, vector<1x16xi32>, vector<1x16xi32>, vector<1x16xi32>, vector<1x16xi32>, vector<1x16xi32>, vector<1x16xi32>, vector<1x16xi32>, vector<1x16xi32>, vector<1x16xi32>, vector<1x16xi32>, vector<1x16xi32>, vector<1x16xi32>, vector<1x16xi32> -> vector<1x256xi32>
    %59 = vector.extract_strided_slice %56 {offsets = [0, 0], sizes = [8, 256], strides = [1, 1]} : vector<8x324xf32> to vector<8x256xf32>
    %c2_i32_17 = arith.constant 2 : i32
    %60 = vector.broadcast %c2_i32_17 : i32 to vector<1x256xi32>
    %61 = arith.cmpi sge, %58, %60 : vector<1x256xi32>
    %cst_18 = arith.constant 0.000000e+00 : f32
    %62 = vector.shape_cast %61 : vector<1x256xi1> to vector<1x256xi1>
    %63 = vector.broadcast %62 : vector<1x256xi1> to vector<8x256xi1>
    %64 = vector.broadcast %cst_18 : f32 to vector<8x256xf32>
    %65 = arith.select %63, %59, %64 : vector<8x256xi1>, vector<8x256xf32>
    %66 = vector.extract_strided_slice %56 {offsets = [0, 2], sizes = [8, 256], strides = [1, 1]} : vector<8x324xf32> to vector<8x256xf32>
    %67 = vector.extract_strided_slice %56 {offsets = [0, 4], sizes = [8, 256], strides = [1, 1]} : vector<8x324xf32> to vector<8x256xf32>
    %c14_i32_19 = arith.constant 14 : i32
    %68 = vector.broadcast %c14_i32_19 : i32 to vector<1x256xi32>
    %69 = arith.cmpi slt, %58, %68 : vector<1x256xi32>
    %cst_20 = arith.constant 0.000000e+00 : f32
    %70 = vector.shape_cast %69 : vector<1x256xi1> to vector<1x256xi1>
    %71 = vector.broadcast %70 : vector<1x256xi1> to vector<8x256xi1>
    %72 = vector.broadcast %cst_20 : f32 to vector<8x256xf32>
    %73 = arith.select %71, %67, %72 : vector<8x256xi1>, vector<8x256xf32>
    %74 = vector.extract_strided_slice %56 {offsets = [0, 32], sizes = [8, 256], strides = [1, 1]} : vector<8x324xf32> to vector<8x256xf32>
    %c2_i32_21 = arith.constant 2 : i32
    %75 = vector.broadcast %c2_i32_21 : i32 to vector<1x256xi32>
    %76 = arith.cmpi sge, %58, %75 : vector<1x256xi32>
    %cst_22 = arith.constant 0.000000e+00 : f32
    %77 = vector.shape_cast %76 : vector<1x256xi1> to vector<1x256xi1>
    %78 = vector.broadcast %77 : vector<1x256xi1> to vector<8x256xi1>
    %79 = vector.broadcast %cst_22 : f32 to vector<8x256xf32>
    %80 = arith.select %78, %74, %79 : vector<8x256xi1>, vector<8x256xf32>
    %81 = vector.extract_strided_slice %56 {offsets = [0, 34], sizes = [8, 256], strides = [1, 1]} : vector<8x324xf32> to vector<8x256xf32>
    %82 = vector.extract_strided_slice %56 {offsets = [0, 36], sizes = [8, 256], strides = [1, 1]} : vector<8x324xf32> to vector<8x256xf32>
    %c14_i32_23 = arith.constant 14 : i32
    %83 = vector.broadcast %c14_i32_23 : i32 to vector<1x256xi32>
    %84 = arith.cmpi slt, %58, %83 : vector<1x256xi32>
    %cst_24 = arith.constant 0.000000e+00 : f32
    %85 = vector.shape_cast %84 : vector<1x256xi1> to vector<1x256xi1>
    %86 = vector.broadcast %85 : vector<1x256xi1> to vector<8x256xi1>
    %87 = vector.broadcast %cst_24 : f32 to vector<8x256xf32>
    %88 = arith.select %86, %82, %87 : vector<8x256xi1>, vector<8x256xf32>
    %89 = vector.extract_strided_slice %56 {offsets = [0, 64], sizes = [8, 256], strides = [1, 1]} : vector<8x324xf32> to vector<8x256xf32>
    %c2_i32_25 = arith.constant 2 : i32
    %90 = vector.broadcast %c2_i32_25 : i32 to vector<1x256xi32>
    %91 = arith.cmpi sge, %58, %90 : vector<1x256xi32>
    %cst_26 = arith.constant 0.000000e+00 : f32
    %92 = vector.shape_cast %91 : vector<1x256xi1> to vector<1x256xi1>
    %93 = vector.broadcast %92 : vector<1x256xi1> to vector<8x256xi1>
    %94 = vector.broadcast %cst_26 : f32 to vector<8x256xf32>
    %95 = arith.select %93, %89, %94 : vector<8x256xi1>, vector<8x256xf32>
    %96 = vector.extract_strided_slice %56 {offsets = [0, 66], sizes = [8, 256], strides = [1, 1]} : vector<8x324xf32> to vector<8x256xf32>
    %97 = vector.extract_strided_slice %56 {offsets = [0, 68], sizes = [8, 256], strides = [1, 1]} : vector<8x324xf32> to vector<8x256xf32>
    %c14_i32_27 = arith.constant 14 : i32
    %98 = vector.broadcast %c14_i32_27 : i32 to vector<1x256xi32>
    %99 = arith.cmpi slt, %58, %98 : vector<1x256xi32>
    %cst_28 = arith.constant 0.000000e+00 : f32
    %100 = vector.shape_cast %99 : vector<1x256xi1> to vector<1x256xi1>
    %101 = vector.broadcast %100 : vector<1x256xi1> to vector<8x256xi1>
    %102 = vector.broadcast %cst_28 : f32 to vector<8x256xf32>
    %103 = arith.select %101, %97, %102 : vector<8x256xi1>, vector<8x256xf32>
    %104 = tpu.concatenate %65, %66, %73, %80, %81, %88, %95, %96, %103 in 0 : vector<8x256xf32>, vector<8x256xf32>, vector<8x256xf32>, vector<8x256xf32>, vector<8x256xf32>, vector<8x256xf32>, vector<8x256xf32>, vector<8x256xf32>, vector<8x256xf32> -> vector<72x256xf32>
    %105 = tpu.concatenate %54, %104 in 1 : vector<72x256xf32>, vector<72x256xf32> -> vector<72x512xf32>
    %106 = arith.truncf %105 : vector<72x512xf32> to vector<72x512xbf16>
    %cst_29 = arith.constant dense<0.000000e+00> : vector<16x512xf32>
    %107 = tpu.matmul %0, %106, %cst_29 {dimension_numbers = #tpu.dot_dimension_numbers<[1], [0], [0], [1], [0, 0, 1, 1], [], []>} : vector<16x72xbf16>, vector<72x512xbf16>, vector<16x512xf32> -> vector<16x512xf32>
    %108 = vector.extract_strided_slice %107 {offsets = [0, 0], sizes = [8, 512], strides = [1, 1]} : vector<16x512xf32> to vector<8x512xf32>
    %109 = vector.extract_strided_slice %108 {offsets = [0, 0], sizes = [8, 256], strides = [1, 1]} : vector<8x512xf32> to vector<8x256xf32>
    %110 = arith.truncf %109 : vector<8x256xf32> to vector<8x256xbf16>
    %c0_30 = arith.constant 0 : index
    %c0_31 = arith.constant 0 : index
    %c0_32 = arith.constant 0 : index
    %111 = vector.load %arg3[%c0_30, %c0_31, %c0_32] : memref<2x8x256xbf16, #tpu.memory_space<vmem>>, vector<1x8x256xbf16>
    %112 = vector.shape_cast %111 : vector<1x8x256xbf16> to vector<8x256xbf16>
    %113 = vector.shape_cast %110 : vector<8x256xbf16> to vector<1x8x256xbf16>
    tpu.vector_store %arg3[%c0_30, %c0_31, %c0_32], %113 {strides = array<i32>} : memref<2x8x256xbf16, #tpu.memory_space<vmem>>, vector<1x8x256xbf16>,
    %114 = vector.extract_strided_slice %108 {offsets = [0, 256], sizes = [8, 256], strides = [1, 1]} : vector<8x512xf32> to vector<8x256xf32>
    %115 = arith.truncf %114 : vector<8x256xf32> to vector<8x256xbf16>
    %c1_33 = arith.constant 1 : index
    %c0_34 = arith.constant 0 : index
    %c0_35 = arith.constant 0 : index
    %116 = vector.load %arg3[%c1_33, %c0_34, %c0_35] : memref<2x8x256xbf16, #tpu.memory_space<vmem>>, vector<1x8x256xbf16>
    %117 = vector.shape_cast %116 : vector<1x8x256xbf16> to vector<8x256xbf16>
    %118 = vector.shape_cast %115 : vector<8x256xbf16> to vector<1x8x256xbf16>
    tpu.vector_store %arg3[%c1_33, %c0_34, %c0_35], %118 {strides = array<i32>} : memref<2x8x256xbf16, #tpu.memory_space<vmem>>, vector<1x8x256xbf16>,
    %119 = vector.extract_strided_slice %107 {offsets = [8, 0], sizes = [8, 512], strides = [1, 1]} : vector<16x512xf32> to vector<8x512xf32>
    %120 = vector.extract_strided_slice %119 {offsets = [0, 0], sizes = [8, 256], strides = [1, 1]} : vector<8x512xf32> to vector<8x256xf32>
    %121 = arith.truncf %120 : vector<8x256xf32> to vector<8x256xbf16>
    %c0_36 = arith.constant 0 : index
    %c0_37 = arith.constant 0 : index
    %c0_38 = arith.constant 0 : index
    %122 = vector.load %arg4[%c0_36, %c0_37, %c0_38] : memref<2x8x256xbf16, #tpu.memory_space<vmem>>, vector<1x8x256xbf16>
    %123 = vector.shape_cast %122 : vector<1x8x256xbf16> to vector<8x256xbf16>
    %124 = vector.shape_cast %121 : vector<8x256xbf16> to vector<1x8x256xbf16>
    tpu.vector_store %arg4[%c0_36, %c0_37, %c0_38], %124 {strides = array<i32>} : memref<2x8x256xbf16, #tpu.memory_space<vmem>>, vector<1x8x256xbf16>,
    %125 = vector.extract_strided_slice %119 {offsets = [0, 256], sizes = [8, 256], strides = [1, 1]} : vector<8x512xf32> to vector<8x256xf32>
    %126 = arith.truncf %125 : vector<8x256xf32> to vector<8x256xbf16>
    %c1_39 = arith.constant 1 : index
    %c0_40 = arith.constant 0 : index
    %c0_41 = arith.constant 0 : index
    %127 = vector.load %arg4[%c1_39, %c0_40, %c0_41] : memref<2x8x256xbf16, #tpu.memory_space<vmem>>, vector<1x8x256xbf16>
    %128 = vector.shape_cast %127 : vector<1x8x256xbf16> to vector<8x256xbf16>
    %129 = vector.shape_cast %126 : vector<8x256xbf16> to vector<1x8x256xbf16>
    tpu.vector_store %arg4[%c1_39, %c0_40, %c0_41], %129 {strides = array<i32>} : memref<2x8x256xbf16, #tpu.memory_space<vmem>>, vector<1x8x256xbf16>,
    %cst_42 = arith.constant dense<0.000000e+00> : vector<8xf32>
    %130 = vector.multi_reduction <add>, %108, %cst_42 [1] : vector<8x512xf32> to vector<8xf32>
    %131 = vector.shape_cast %130 : vector<8xf32> to vector<8x1xf32>
    %132 = arith.mulf %108, %108 : vector<8x512xf32>
    %cst_43 = arith.constant dense<0.000000e+00> : vector<8xf32>
    %133 = vector.multi_reduction <add>, %132, %cst_43 [1] : vector<8x512xf32> to vector<8xf32>
    %134 = vector.shape_cast %133 : vector<8xf32> to vector<8x1xf32>
    %cst_44 = arith.constant dense<0.000000e+00> : vector<8xf32>
    %135 = vector.multi_reduction <add>, %119, %cst_44 [1] : vector<8x512xf32> to vector<8xf32>
    %136 = vector.shape_cast %135 : vector<8xf32> to vector<8x1xf32>
    %137 = arith.mulf %119, %119 : vector<8x512xf32>
    %cst_45 = arith.constant dense<0.000000e+00> : vector<8xf32>
    %138 = vector.multi_reduction <add>, %137, %cst_45 [1] : vector<8x512xf32> to vector<8xf32>
    %139 = vector.shape_cast %138 : vector<8xf32> to vector<8x1xf32>
    %140 = tpu.concatenate %131, %134, %136, %139 in 1 : vector<8x1xf32>, vector<8x1xf32>, vector<8x1xf32>, vector<8x1xf32> -> vector<8x4xf32>
    %c0_46 = arith.constant 0 : index
    %c0_47 = arith.constant 0 : index
    %c0_48 = arith.constant 0 : index
    %141 = vector.load %arg5[%c0_46, %c0_47, %c0_48] : memref<1x8x4xf32, #tpu.memory_space<vmem>>, vector<1x8x4xf32>
    %142 = vector.shape_cast %141 : vector<1x8x4xf32> to vector<8x4xf32>
    %143 = vector.shape_cast %140 : vector<8x4xf32> to vector<1x8x4xf32>
    tpu.vector_store %arg5[%c0_46, %c0_47, %c0_48], %143 {strides = array<i32>} : memref<1x8x4xf32, #tpu.memory_space<vmem>>, vector<1x8x4xf32>,
    return
  }
  func.func @transform_0(%arg0: i32) -> (i32, i32, i32) {
    %c0_i32 = arith.constant 0 : i32
    %c0_i32_0 = arith.constant 0 : i32
    %c0_i32_1 = arith.constant 0 : i32
    return %arg0, %c0_i32, %c0_i32_0 : i32, i32, i32
  }
  func.func @transform_1(%arg0: i32) -> (i32, i32) {
    %c0_i32 = arith.constant 0 : i32
    %c0_i32_0 = arith.constant 0 : i32
    %c0_i32_1 = arith.constant 0 : i32
    return %c0_i32, %c0_i32_0 : i32, i32
  }
  func.func @transform_2(%arg0: i32) -> (i32, i32, i32) {
    %c0_i32 = arith.constant 0 : i32
    %c0_i32_0 = arith.constant 0 : i32
    %c0_i32_1 = arith.constant 0 : i32
    return %arg0, %c0_i32, %c0_i32_0 : i32, i32, i32
  }
  func.func @transform_3(%arg0: i32) -> (i32, i32, i32) {
    %c0_i32 = arith.constant 0 : i32
    %c0_i32_0 = arith.constant 0 : i32
    %c0_i32_1 = arith.constant 0 : i32
    return %arg0, %c0_i32, %c0_i32_0 : i32, i32, i32
  }
  func.func @transform_4(%arg0: i32) -> (i32, i32, i32) {
    %c0_i32 = arith.constant 0 : i32
    %c0_i32_0 = arith.constant 0 : i32
    %c0_i32_1 = arith.constant 0 : i32
    return %arg0, %c0_i32, %c0_i32_0 : i32, i32, i32
  }
}

module attributes {stable_mosaic.version = 11 : i64} {
  func.func @_bn_add_relu_kernel(%arg0: i32, %arg1: i32, %arg2: memref<2x8x256xbf16, #tpu.memory_space<vmem>>, %arg3: memref<2x8x256xbf16, #tpu.memory_space<vmem>>, %arg4: memref<8x1xf32, #tpu.memory_space<vmem>>, %arg5: memref<8x1xf32, #tpu.memory_space<vmem>>, %arg6: memref<8x1xf32, #tpu.memory_space<vmem>>, %arg7: memref<8x1xf32, #tpu.memory_space<vmem>>, %arg8: memref<2x8x256xf32, #tpu.memory_space<vmem>>) attributes {dimension_semantics = [#tpu.dimension_semantics<parallel>, #tpu.dimension_semantics<parallel>], iteration_bounds = array<i64: 1, 1>, scalar_prefetch = 0 : i64, scratch_operands = 0 : i64, tpu.core_type = #tpu.core_type<tc>, window_params = [{transform_indices = @transform_0, window_bounds = array<i64: 2, 8, 256>}, {transform_indices = @transform_1, window_bounds = array<i64: 2, 8, 256>}, {pipeline_mode = #tpu.pipeline_mode<synchronous>, transform_indices = @transform_2, window_bounds = array<i64: 8, 1>}, {pipeline_mode = #tpu.pipeline_mode<synchronous>, transform_indices = @transform_3, window_bounds = array<i64: 8, 1>}, {pipeline_mode = #tpu.pipeline_mode<synchronous>, transform_indices = @transform_4, window_bounds = array<i64: 8, 1>}, {pipeline_mode = #tpu.pipeline_mode<synchronous>, transform_indices = @transform_5, window_bounds = array<i64: 8, 1>}, {transform_indices = @transform_6, window_bounds = array<i64: 2, 8, 256>}]} {
    %c0 = arith.constant 0 : index
    %c0_0 = arith.constant 0 : index
    %c0_1 = arith.constant 0 : index
    %0 = vector.load %arg2[%c0, %c0_0, %c0_1] : memref<2x8x256xbf16, #tpu.memory_space<vmem>>, vector<2x8x256xbf16>
    %1 = arith.extf %0 : vector<2x8x256xbf16> to vector<2x8x256xf32>
    %c0_2 = arith.constant 0 : index
    %c0_3 = arith.constant 0 : index
    %c0_4 = arith.constant 0 : index
    %2 = vector.load %arg3[%c0_2, %c0_3, %c0_4] : memref<2x8x256xbf16, #tpu.memory_space<vmem>>, vector<2x8x256xbf16>
    %3 = arith.extf %2 : vector<2x8x256xbf16> to vector<2x8x256xf32>
    %c0_5 = arith.constant 0 : index
    %c0_6 = arith.constant 0 : index
    %4 = vector.load %arg4[%c0_5, %c0_6] : memref<8x1xf32, #tpu.memory_space<vmem>>, vector<8x1xf32>
    %5 = vector.shape_cast %4 : vector<8x1xf32> to vector<1x8x1xf32>
    %6 = vector.broadcast %5 : vector<1x8x1xf32> to vector<2x8x256xf32>
    %7 = arith.mulf %1, %6 : vector<2x8x256xf32>
    %c0_7 = arith.constant 0 : index
    %c0_8 = arith.constant 0 : index
    %8 = vector.load %arg5[%c0_7, %c0_8] : memref<8x1xf32, #tpu.memory_space<vmem>>, vector<8x1xf32>
    %9 = vector.shape_cast %8 : vector<8x1xf32> to vector<1x8x1xf32>
    %10 = vector.broadcast %9 : vector<1x8x1xf32> to vector<2x8x256xf32>
    %11 = arith.addf %7, %10 : vector<2x8x256xf32>
    %c0_9 = arith.constant 0 : index
    %c0_10 = arith.constant 0 : index
    %12 = vector.load %arg6[%c0_9, %c0_10] : memref<8x1xf32, #tpu.memory_space<vmem>>, vector<8x1xf32>
    %13 = vector.shape_cast %12 : vector<8x1xf32> to vector<1x8x1xf32>
    %14 = vector.broadcast %13 : vector<1x8x1xf32> to vector<2x8x256xf32>
    %15 = arith.mulf %3, %14 : vector<2x8x256xf32>
    %16 = arith.addf %11, %15 : vector<2x8x256xf32>
    %c0_11 = arith.constant 0 : index
    %c0_12 = arith.constant 0 : index
    %17 = vector.load %arg7[%c0_11, %c0_12] : memref<8x1xf32, #tpu.memory_space<vmem>>, vector<8x1xf32>
    %18 = vector.shape_cast %17 : vector<8x1xf32> to vector<1x8x1xf32>
    %19 = vector.broadcast %18 : vector<1x8x1xf32> to vector<2x8x256xf32>
    %20 = arith.addf %16, %19 : vector<2x8x256xf32>
    %cst = arith.constant 0.000000e+00 : f32
    %21 = vector.broadcast %cst : f32 to vector<2x8x256xf32>
    %22 = arith.maximumf %20, %21 : vector<2x8x256xf32>
    %c0_13 = arith.constant 0 : index
    %c0_14 = arith.constant 0 : index
    %c0_15 = arith.constant 0 : index
    %23 = vector.load %arg8[%c0_13, %c0_14, %c0_15] : memref<2x8x256xf32, #tpu.memory_space<vmem>>, vector<2x8x256xf32>
    tpu.vector_store %arg8[%c0_13, %c0_14, %c0_15], %22 {strides = array<i32>} : memref<2x8x256xf32, #tpu.memory_space<vmem>>, vector<2x8x256xf32>,
    return
  }
  func.func @transform_0(%arg0: i32, %arg1: i32) -> (i32, i32, i32) {
    %c0_i32 = arith.constant 0 : i32
    %c0_i32_0 = arith.constant 0 : i32
    return %arg0, %c0_i32, %arg1 : i32, i32, i32
  }
  func.func @transform_1(%arg0: i32, %arg1: i32) -> (i32, i32, i32) {
    %c0_i32 = arith.constant 0 : i32
    %c0_i32_0 = arith.constant 0 : i32
    return %arg0, %c0_i32, %arg1 : i32, i32, i32
  }
  func.func @transform_2(%arg0: i32, %arg1: i32) -> (i32, i32) {
    %c0_i32 = arith.constant 0 : i32
    %c0_i32_0 = arith.constant 0 : i32
    %c0_i32_1 = arith.constant 0 : i32
    return %c0_i32, %c0_i32_0 : i32, i32
  }
  func.func @transform_3(%arg0: i32, %arg1: i32) -> (i32, i32) {
    %c0_i32 = arith.constant 0 : i32
    %c0_i32_0 = arith.constant 0 : i32
    %c0_i32_1 = arith.constant 0 : i32
    return %c0_i32, %c0_i32_0 : i32, i32
  }
  func.func @transform_4(%arg0: i32, %arg1: i32) -> (i32, i32) {
    %c0_i32 = arith.constant 0 : i32
    %c0_i32_0 = arith.constant 0 : i32
    %c0_i32_1 = arith.constant 0 : i32
    return %c0_i32, %c0_i32_0 : i32, i32
  }
  func.func @transform_5(%arg0: i32, %arg1: i32) -> (i32, i32) {
    %c0_i32 = arith.constant 0 : i32
    %c0_i32_0 = arith.constant 0 : i32
    %c0_i32_1 = arith.constant 0 : i32
    return %c0_i32, %c0_i32_0 : i32, i32
  }
  func.func @transform_6(%arg0: i32, %arg1: i32) -> (i32, i32, i32) {
    %c0_i32 = arith.constant 0 : i32
    %c0_i32_0 = arith.constant 0 : i32
    return %arg0, %c0_i32, %arg1 : i32, i32, i32
  }
}

module attributes {stable_mosaic.version = 11 : i64} {
  func.func @_bn_relu_conv2_kernel(%arg0: i32, %arg1: memref<2x8x256xbf16, #tpu.memory_space<vmem>>, %arg2: memref<8x1xf32, #tpu.memory_space<vmem>>, %arg3: memref<8x1xf32, #tpu.memory_space<vmem>>, %arg4: memref<8x72xbf16, #tpu.memory_space<vmem>>, %arg5: memref<2x8x256xbf16, #tpu.memory_space<vmem>>, %arg6: memref<1x8x2xf32, #tpu.memory_space<vmem>>) attributes {dimension_semantics = [#tpu.dimension_semantics<parallel>], iteration_bounds = array<i64: 1>, scalar_prefetch = 0 : i64, scratch_operands = 0 : i64, tpu.core_type = #tpu.core_type<tc>, window_params = [{transform_indices = @transform_0, window_bounds = array<i64: 2, 8, 256>}, {pipeline_mode = #tpu.pipeline_mode<synchronous>, transform_indices = @transform_1, window_bounds = array<i64: 8, 1>}, {pipeline_mode = #tpu.pipeline_mode<synchronous>, transform_indices = @transform_2, window_bounds = array<i64: 8, 1>}, {pipeline_mode = #tpu.pipeline_mode<synchronous>, transform_indices = @transform_3, window_bounds = array<i64: 8, 72>}, {transform_indices = @transform_4, window_bounds = array<i64: 2, 8, 256>}, {transform_indices = @transform_5, window_bounds = array<i64: 1, 8, 2>}]} {
    %c0 = arith.constant 0 : index
    %c0_0 = arith.constant 0 : index
    %0 = vector.load %arg2[%c0, %c0_0] : memref<8x1xf32, #tpu.memory_space<vmem>>, vector<8x1xf32>
    %c0_1 = arith.constant 0 : index
    %c0_2 = arith.constant 0 : index
    %1 = vector.load %arg3[%c0_1, %c0_2] : memref<8x1xf32, #tpu.memory_space<vmem>>, vector<8x1xf32>
    %c0_3 = arith.constant 0 : index
    %c0_4 = arith.constant 0 : index
    %2 = vector.load %arg4[%c0_3, %c0_4] : memref<8x72xbf16, #tpu.memory_space<vmem>>, vector<8x72xbf16>
    %c0_5 = arith.constant 0 : index
    %c0_6 = arith.constant 0 : index
    %c0_7 = arith.constant 0 : index
    %3 = vector.load %arg1[%c0_5, %c0_6, %c0_7] : memref<2x8x256xbf16, #tpu.memory_space<vmem>>, vector<1x8x256xbf16>
    %4 = vector.shape_cast %3 : vector<1x8x256xbf16> to vector<8x256xbf16>
    %5 = arith.extf %4 : vector<8x256xbf16> to vector<8x256xf32>
    %6 = vector.broadcast %0 : vector<8x1xf32> to vector<8x256xf32>
    %7 = arith.mulf %5, %6 : vector<8x256xf32>
    %8 = vector.broadcast %1 : vector<8x1xf32> to vector<8x256xf32>
    %9 = arith.addf %7, %8 : vector<8x256xf32>
    %cst = arith.constant 0.000000e+00 : f32
    %10 = vector.broadcast %cst : f32 to vector<8x256xf32>
    %11 = arith.maximumf %9, %10 : vector<8x256xf32>
    %c1 = arith.constant 1 : index
    %c0_8 = arith.constant 0 : index
    %c0_9 = arith.constant 0 : index
    %12 = vector.load %arg1[%c1, %c0_8, %c0_9] : memref<2x8x256xbf16, #tpu.memory_space<vmem>>, vector<1x8x256xbf16>
    %13 = vector.shape_cast %12 : vector<1x8x256xbf16> to vector<8x256xbf16>
    %14 = arith.extf %13 : vector<8x256xbf16> to vector<8x256xf32>
    %15 = vector.broadcast %0 : vector<8x1xf32> to vector<8x256xf32>
    %16 = arith.mulf %14, %15 : vector<8x256xf32>
    %17 = vector.broadcast %1 : vector<8x1xf32> to vector<8x256xf32>
    %18 = arith.addf %16, %17 : vector<8x256xf32>
    %cst_10 = arith.constant 0.000000e+00 : f32
    %19 = vector.broadcast %cst_10 : f32 to vector<8x256xf32>
    %20 = arith.maximumf %18, %19 : vector<8x256xf32>
    %cst_11 = arith.constant 0.000000e+00 : f32
    %21 = vector.broadcast %cst_11 : f32 to vector<8x34xf32>
    %22 = tpu.concatenate %21, %11, %21 in 1 : vector<8x34xf32>, vector<8x256xf32>, vector<8x34xf32> -> vector<8x324xf32>
    %23 = tpu.iota {dimensions = array<i32: 1>} : vector<1x16xi32>
    %24 = tpu.concatenate %23, %23, %23, %23, %23, %23, %23, %23, %23, %23, %23, %23, %23, %23, %23, %23 in 1 : vector<1x16xi32>, vector<1x16xi32>, vector<1x16xi32>, vector<1x16xi32>, vector<1x16xi32>, vector<1x16xi32>, vector<1x16xi32>, vector<1x16xi32>, vector<1x16xi32>, vector<1x16xi32>, vector<1x16xi32>, vector<1x16xi32>, vector<1x16xi32>, vector<1x16xi32>, vector<1x16xi32>, vector<1x16xi32> -> vector<1x256xi32>
    %25 = vector.extract_strided_slice %22 {offsets = [0, 0], sizes = [8, 256], strides = [1, 1]} : vector<8x324xf32> to vector<8x256xf32>
    %c2_i32 = arith.constant 2 : i32
    %26 = vector.broadcast %c2_i32 : i32 to vector<1x256xi32>
    %27 = arith.cmpi sge, %24, %26 : vector<1x256xi32>
    %cst_12 = arith.constant 0.000000e+00 : f32
    %28 = vector.shape_cast %27 : vector<1x256xi1> to vector<1x256xi1>
    %29 = vector.broadcast %28 : vector<1x256xi1> to vector<8x256xi1>
    %30 = vector.broadcast %cst_12 : f32 to vector<8x256xf32>
    %31 = arith.select %29, %25, %30 : vector<8x256xi1>, vector<8x256xf32>
    %32 = vector.extract_strided_slice %22 {offsets = [0, 2], sizes = [8, 256], strides = [1, 1]} : vector<8x324xf32> to vector<8x256xf32>
    %33 = vector.extract_strided_slice %22 {offsets = [0, 4], sizes = [8, 256], strides = [1, 1]} : vector<8x324xf32> to vector<8x256xf32>
    %c14_i32 = arith.constant 14 : i32
    %34 = vector.broadcast %c14_i32 : i32 to vector<1x256xi32>
    %35 = arith.cmpi slt, %24, %34 : vector<1x256xi32>
    %cst_13 = arith.constant 0.000000e+00 : f32
    %36 = vector.shape_cast %35 : vector<1x256xi1> to vector<1x256xi1>
    %37 = vector.broadcast %36 : vector<1x256xi1> to vector<8x256xi1>
    %38 = vector.broadcast %cst_13 : f32 to vector<8x256xf32>
    %39 = arith.select %37, %33, %38 : vector<8x256xi1>, vector<8x256xf32>
    %40 = vector.extract_strided_slice %22 {offsets = [0, 32], sizes = [8, 256], strides = [1, 1]} : vector<8x324xf32> to vector<8x256xf32>
    %c2_i32_14 = arith.constant 2 : i32
    %41 = vector.broadcast %c2_i32_14 : i32 to vector<1x256xi32>
    %42 = arith.cmpi sge, %24, %41 : vector<1x256xi32>
    %cst_15 = arith.constant 0.000000e+00 : f32
    %43 = vector.shape_cast %42 : vector<1x256xi1> to vector<1x256xi1>
    %44 = vector.broadcast %43 : vector<1x256xi1> to vector<8x256xi1>
    %45 = vector.broadcast %cst_15 : f32 to vector<8x256xf32>
    %46 = arith.select %44, %40, %45 : vector<8x256xi1>, vector<8x256xf32>
    %47 = vector.extract_strided_slice %22 {offsets = [0, 34], sizes = [8, 256], strides = [1, 1]} : vector<8x324xf32> to vector<8x256xf32>
    %48 = vector.extract_strided_slice %22 {offsets = [0, 36], sizes = [8, 256], strides = [1, 1]} : vector<8x324xf32> to vector<8x256xf32>
    %c14_i32_16 = arith.constant 14 : i32
    %49 = vector.broadcast %c14_i32_16 : i32 to vector<1x256xi32>
    %50 = arith.cmpi slt, %24, %49 : vector<1x256xi32>
    %cst_17 = arith.constant 0.000000e+00 : f32
    %51 = vector.shape_cast %50 : vector<1x256xi1> to vector<1x256xi1>
    %52 = vector.broadcast %51 : vector<1x256xi1> to vector<8x256xi1>
    %53 = vector.broadcast %cst_17 : f32 to vector<8x256xf32>
    %54 = arith.select %52, %48, %53 : vector<8x256xi1>, vector<8x256xf32>
    %55 = vector.extract_strided_slice %22 {offsets = [0, 64], sizes = [8, 256], strides = [1, 1]} : vector<8x324xf32> to vector<8x256xf32>
    %c2_i32_18 = arith.constant 2 : i32
    %56 = vector.broadcast %c2_i32_18 : i32 to vector<1x256xi32>
    %57 = arith.cmpi sge, %24, %56 : vector<1x256xi32>
    %cst_19 = arith.constant 0.000000e+00 : f32
    %58 = vector.shape_cast %57 : vector<1x256xi1> to vector<1x256xi1>
    %59 = vector.broadcast %58 : vector<1x256xi1> to vector<8x256xi1>
    %60 = vector.broadcast %cst_19 : f32 to vector<8x256xf32>
    %61 = arith.select %59, %55, %60 : vector<8x256xi1>, vector<8x256xf32>
    %62 = vector.extract_strided_slice %22 {offsets = [0, 66], sizes = [8, 256], strides = [1, 1]} : vector<8x324xf32> to vector<8x256xf32>
    %63 = vector.extract_strided_slice %22 {offsets = [0, 68], sizes = [8, 256], strides = [1, 1]} : vector<8x324xf32> to vector<8x256xf32>
    %c14_i32_20 = arith.constant 14 : i32
    %64 = vector.broadcast %c14_i32_20 : i32 to vector<1x256xi32>
    %65 = arith.cmpi slt, %24, %64 : vector<1x256xi32>
    %cst_21 = arith.constant 0.000000e+00 : f32
    %66 = vector.shape_cast %65 : vector<1x256xi1> to vector<1x256xi1>
    %67 = vector.broadcast %66 : vector<1x256xi1> to vector<8x256xi1>
    %68 = vector.broadcast %cst_21 : f32 to vector<8x256xf32>
    %69 = arith.select %67, %63, %68 : vector<8x256xi1>, vector<8x256xf32>
    %70 = tpu.concatenate %31, %32, %39, %46, %47, %54, %61, %62, %69 in 0 : vector<8x256xf32>, vector<8x256xf32>, vector<8x256xf32>, vector<8x256xf32>, vector<8x256xf32>, vector<8x256xf32>, vector<8x256xf32>, vector<8x256xf32>, vector<8x256xf32> -> vector<72x256xf32>
    %cst_22 = arith.constant 0.000000e+00 : f32
    %71 = vector.broadcast %cst_22 : f32 to vector<8x34xf32>
    %72 = tpu.concatenate %71, %20, %71 in 1 : vector<8x34xf32>, vector<8x256xf32>, vector<8x34xf32> -> vector<8x324xf32>
    %73 = tpu.iota {dimensions = array<i32: 1>} : vector<1x16xi32>
    %74 = tpu.concatenate %73, %73, %73, %73, %73, %73, %73, %73, %73, %73, %73, %73, %73, %73, %73, %73 in 1 : vector<1x16xi32>, vector<1x16xi32>, vector<1x16xi32>, vector<1x16xi32>, vector<1x16xi32>, vector<1x16xi32>, vector<1x16xi32>, vector<1x16xi32>, vector<1x16xi32>, vector<1x16xi32>, vector<1x16xi32>, vector<1x16xi32>, vector<1x16xi32>, vector<1x16xi32>, vector<1x16xi32>, vector<1x16xi32> -> vector<1x256xi32>
    %75 = vector.extract_strided_slice %72 {offsets = [0, 0], sizes = [8, 256], strides = [1, 1]} : vector<8x324xf32> to vector<8x256xf32>
    %c2_i32_23 = arith.constant 2 : i32
    %76 = vector.broadcast %c2_i32_23 : i32 to vector<1x256xi32>
    %77 = arith.cmpi sge, %74, %76 : vector<1x256xi32>
    %cst_24 = arith.constant 0.000000e+00 : f32
    %78 = vector.shape_cast %77 : vector<1x256xi1> to vector<1x256xi1>
    %79 = vector.broadcast %78 : vector<1x256xi1> to vector<8x256xi1>
    %80 = vector.broadcast %cst_24 : f32 to vector<8x256xf32>
    %81 = arith.select %79, %75, %80 : vector<8x256xi1>, vector<8x256xf32>
    %82 = vector.extract_strided_slice %72 {offsets = [0, 2], sizes = [8, 256], strides = [1, 1]} : vector<8x324xf32> to vector<8x256xf32>
    %83 = vector.extract_strided_slice %72 {offsets = [0, 4], sizes = [8, 256], strides = [1, 1]} : vector<8x324xf32> to vector<8x256xf32>
    %c14_i32_25 = arith.constant 14 : i32
    %84 = vector.broadcast %c14_i32_25 : i32 to vector<1x256xi32>
    %85 = arith.cmpi slt, %74, %84 : vector<1x256xi32>
    %cst_26 = arith.constant 0.000000e+00 : f32
    %86 = vector.shape_cast %85 : vector<1x256xi1> to vector<1x256xi1>
    %87 = vector.broadcast %86 : vector<1x256xi1> to vector<8x256xi1>
    %88 = vector.broadcast %cst_26 : f32 to vector<8x256xf32>
    %89 = arith.select %87, %83, %88 : vector<8x256xi1>, vector<8x256xf32>
    %90 = vector.extract_strided_slice %72 {offsets = [0, 32], sizes = [8, 256], strides = [1, 1]} : vector<8x324xf32> to vector<8x256xf32>
    %c2_i32_27 = arith.constant 2 : i32
    %91 = vector.broadcast %c2_i32_27 : i32 to vector<1x256xi32>
    %92 = arith.cmpi sge, %74, %91 : vector<1x256xi32>
    %cst_28 = arith.constant 0.000000e+00 : f32
    %93 = vector.shape_cast %92 : vector<1x256xi1> to vector<1x256xi1>
    %94 = vector.broadcast %93 : vector<1x256xi1> to vector<8x256xi1>
    %95 = vector.broadcast %cst_28 : f32 to vector<8x256xf32>
    %96 = arith.select %94, %90, %95 : vector<8x256xi1>, vector<8x256xf32>
    %97 = vector.extract_strided_slice %72 {offsets = [0, 34], sizes = [8, 256], strides = [1, 1]} : vector<8x324xf32> to vector<8x256xf32>
    %98 = vector.extract_strided_slice %72 {offsets = [0, 36], sizes = [8, 256], strides = [1, 1]} : vector<8x324xf32> to vector<8x256xf32>
    %c14_i32_29 = arith.constant 14 : i32
    %99 = vector.broadcast %c14_i32_29 : i32 to vector<1x256xi32>
    %100 = arith.cmpi slt, %74, %99 : vector<1x256xi32>
    %cst_30 = arith.constant 0.000000e+00 : f32
    %101 = vector.shape_cast %100 : vector<1x256xi1> to vector<1x256xi1>
    %102 = vector.broadcast %101 : vector<1x256xi1> to vector<8x256xi1>
    %103 = vector.broadcast %cst_30 : f32 to vector<8x256xf32>
    %104 = arith.select %102, %98, %103 : vector<8x256xi1>, vector<8x256xf32>
    %105 = vector.extract_strided_slice %72 {offsets = [0, 64], sizes = [8, 256], strides = [1, 1]} : vector<8x324xf32> to vector<8x256xf32>
    %c2_i32_31 = arith.constant 2 : i32
    %106 = vector.broadcast %c2_i32_31 : i32 to vector<1x256xi32>
    %107 = arith.cmpi sge, %74, %106 : vector<1x256xi32>
    %cst_32 = arith.constant 0.000000e+00 : f32
    %108 = vector.shape_cast %107 : vector<1x256xi1> to vector<1x256xi1>
    %109 = vector.broadcast %108 : vector<1x256xi1> to vector<8x256xi1>
    %110 = vector.broadcast %cst_32 : f32 to vector<8x256xf32>
    %111 = arith.select %109, %105, %110 : vector<8x256xi1>, vector<8x256xf32>
    %112 = vector.extract_strided_slice %72 {offsets = [0, 66], sizes = [8, 256], strides = [1, 1]} : vector<8x324xf32> to vector<8x256xf32>
    %113 = vector.extract_strided_slice %72 {offsets = [0, 68], sizes = [8, 256], strides = [1, 1]} : vector<8x324xf32> to vector<8x256xf32>
    %c14_i32_33 = arith.constant 14 : i32
    %114 = vector.broadcast %c14_i32_33 : i32 to vector<1x256xi32>
    %115 = arith.cmpi slt, %74, %114 : vector<1x256xi32>
    %cst_34 = arith.constant 0.000000e+00 : f32
    %116 = vector.shape_cast %115 : vector<1x256xi1> to vector<1x256xi1>
    %117 = vector.broadcast %116 : vector<1x256xi1> to vector<8x256xi1>
    %118 = vector.broadcast %cst_34 : f32 to vector<8x256xf32>
    %119 = arith.select %117, %113, %118 : vector<8x256xi1>, vector<8x256xf32>
    %120 = tpu.concatenate %81, %82, %89, %96, %97, %104, %111, %112, %119 in 0 : vector<8x256xf32>, vector<8x256xf32>, vector<8x256xf32>, vector<8x256xf32>, vector<8x256xf32>, vector<8x256xf32>, vector<8x256xf32>, vector<8x256xf32>, vector<8x256xf32> -> vector<72x256xf32>
    %121 = tpu.concatenate %70, %120 in 1 : vector<72x256xf32>, vector<72x256xf32> -> vector<72x512xf32>
    %122 = arith.truncf %121 : vector<72x512xf32> to vector<72x512xbf16>
    %cst_35 = arith.constant dense<0.000000e+00> : vector<8x512xf32>
    %123 = tpu.matmul %2, %122, %cst_35 {dimension_numbers = #tpu.dot_dimension_numbers<[1], [0], [0], [1], [0, 0, 1, 1], [], []>} : vector<8x72xbf16>, vector<72x512xbf16>, vector<8x512xf32> -> vector<8x512xf32>
    %124 = vector.extract_strided_slice %123 {offsets = [0, 0], sizes = [8, 256], strides = [1, 1]} : vector<8x512xf32> to vector<8x256xf32>
    %125 = arith.truncf %124 : vector<8x256xf32> to vector<8x256xbf16>
    %c0_36 = arith.constant 0 : index
    %c0_37 = arith.constant 0 : index
    %c0_38 = arith.constant 0 : index
    %126 = vector.load %arg5[%c0_36, %c0_37, %c0_38] : memref<2x8x256xbf16, #tpu.memory_space<vmem>>, vector<1x8x256xbf16>
    %127 = vector.shape_cast %126 : vector<1x8x256xbf16> to vector<8x256xbf16>
    %128 = vector.shape_cast %125 : vector<8x256xbf16> to vector<1x8x256xbf16>
    tpu.vector_store %arg5[%c0_36, %c0_37, %c0_38], %128 {strides = array<i32>} : memref<2x8x256xbf16, #tpu.memory_space<vmem>>, vector<1x8x256xbf16>,
    %129 = vector.extract_strided_slice %123 {offsets = [0, 256], sizes = [8, 256], strides = [1, 1]} : vector<8x512xf32> to vector<8x256xf32>
    %130 = arith.truncf %129 : vector<8x256xf32> to vector<8x256xbf16>
    %c1_39 = arith.constant 1 : index
    %c0_40 = arith.constant 0 : index
    %c0_41 = arith.constant 0 : index
    %131 = vector.load %arg5[%c1_39, %c0_40, %c0_41] : memref<2x8x256xbf16, #tpu.memory_space<vmem>>, vector<1x8x256xbf16>
    %132 = vector.shape_cast %131 : vector<1x8x256xbf16> to vector<8x256xbf16>
    %133 = vector.shape_cast %130 : vector<8x256xbf16> to vector<1x8x256xbf16>
    tpu.vector_store %arg5[%c1_39, %c0_40, %c0_41], %133 {strides = array<i32>} : memref<2x8x256xbf16, #tpu.memory_space<vmem>>, vector<1x8x256xbf16>,
    %cst_42 = arith.constant dense<0.000000e+00> : vector<8xf32>
    %134 = vector.multi_reduction <add>, %123, %cst_42 [1] : vector<8x512xf32> to vector<8xf32>
    %135 = vector.shape_cast %134 : vector<8xf32> to vector<8x1xf32>
    %136 = arith.mulf %123, %123 : vector<8x512xf32>
    %cst_43 = arith.constant dense<0.000000e+00> : vector<8xf32>
    %137 = vector.multi_reduction <add>, %136, %cst_43 [1] : vector<8x512xf32> to vector<8xf32>
    %138 = vector.shape_cast %137 : vector<8xf32> to vector<8x1xf32>
    %139 = tpu.concatenate %135, %138 in 1 : vector<8x1xf32>, vector<8x1xf32> -> vector<8x2xf32>
    %c0_44 = arith.constant 0 : index
    %c0_45 = arith.constant 0 : index
    %c0_46 = arith.constant 0 : index
    %140 = vector.load %arg6[%c0_44, %c0_45, %c0_46] : memref<1x8x2xf32, #tpu.memory_space<vmem>>, vector<1x8x2xf32>
    %141 = vector.shape_cast %140 : vector<1x8x2xf32> to vector<8x2xf32>
    %142 = vector.shape_cast %139 : vector<8x2xf32> to vector<1x8x2xf32>
    tpu.vector_store %arg6[%c0_44, %c0_45, %c0_46], %142 {strides = array<i32>} : memref<1x8x2xf32, #tpu.memory_space<vmem>>, vector<1x8x2xf32>,
    return
  }
  func.func @transform_0(%arg0: i32) -> (i32, i32, i32) {
    %c0_i32 = arith.constant 0 : i32
    %c0_i32_0 = arith.constant 0 : i32
    %c0_i32_1 = arith.constant 0 : i32
    return %arg0, %c0_i32, %c0_i32_0 : i32, i32, i32
  }
  func.func @transform_1(%arg0: i32) -> (i32, i32) {
    %c0_i32 = arith.constant 0 : i32
    %c0_i32_0 = arith.constant 0 : i32
    %c0_i32_1 = arith.constant 0 : i32
    return %c0_i32, %c0_i32_0 : i32, i32
  }
  func.func @transform_2(%arg0: i32) -> (i32, i32) {
    %c0_i32 = arith.constant 0 : i32
    %c0_i32_0 = arith.constant 0 : i32
    %c0_i32_1 = arith.constant 0 : i32
    return %c0_i32, %c0_i32_0 : i32, i32
  }
  func.func @transform_3(%arg0: i32) -> (i32, i32) {
    %c0_i32 = arith.constant 0 : i32
    %c0_i32_0 = arith.constant 0 : i32
    %c0_i32_1 = arith.constant 0 : i32
    return %c0_i32, %c0_i32_0 : i32, i32
  }
  func.func @transform_4(%arg0: i32) -> (i32, i32, i32) {
    %c0_i32 = arith.constant 0 : i32
    %c0_i32_0 = arith.constant 0 : i32
    %c0_i32_1 = arith.constant 0 : i32
    return %arg0, %c0_i32, %c0_i32_0 : i32, i32, i32
  }
  func.func @transform_5(%arg0: i32) -> (i32, i32, i32) {
    %c0_i32 = arith.constant 0 : i32
    %c0_i32_0 = arith.constant 0 : i32
    %c0_i32_1 = arith.constant 0 : i32
    return %arg0, %c0_i32, %c0_i32_0 : i32, i32, i32
  }
}

</mosaic_0001>

<bundles_post_ra>
// kernel: dilated_res_block_forward.5
= control target key start
LH: loop header
LB: loop body
LE: loop exit
PB: predicated region body
PF: predicated region fallthrough
CT: control target
= control target key end

     0   :  { %v94_v0 = vmov 0   ;;  %s166_s4 = inlined_call_operand.vmem [shape: f32[8,1], index: 4, kind: input, shape index: {}]   ;;  %s167_s2 = inlined_call_operand.vmem [shape: f32[8,1], index: 2, kind: input, shape index: {}]   ;;  %s168_s5 = inlined_call_operand.vmem [shape: f32[8,1], index: 5, kind: input, shape index: {}]   ;;  %s169_s3 = inlined_call_operand.vmem [shape: f32[8,1], index: 3, kind: input, shape index: {}]   ;;  %s170_s1 = inlined_call_operand.vmem [shape: bf16[2,8,256], index: 1, kind: input, shape index: {}]   ;;  %s171_s0 = inlined_call_operand.vmem [shape: bf16[2,8,256], index: 0, kind: input, shape index: {}]   ;;  %s172_s6 = inlined_call_operand.vmem [shape: f32[2,8,256], index: 6, kind: output, shape index: {}]  }
   0x1   :  { %93 = vset.pattern.permute.xlu1 %v94_v0  ;;  %92 = vset.pattern.permute.xlu0 %v94_v0  ;;  %v55_v1 = vld [vmem:[%s166_s4] sm:$0xff]  ;;  %v30_v6 = vld [vmem:[%s170_s1 + $0x8] sm:$0xff] }
   0x2   :  { %v35_v2 = vld [vmem:[%s167_s2] sm:$0xff]  ;;  %58 = vperm.xlu1 %93, %v55_v1   ;;  %v24_v8 = vld [vmem:[%s171_s0 + $0x8] sm:$0xff]  ;;  %v33_v11 = vunpack.c.l.bf16 %v30_v6  ;;  %v34_v12 = vunpack.c.h.bf16 %v30_v6 }
   0x3   :  { %38 = vperm.xlu0 %92, %v35_v2   ;;  %v69_v3 = vld [vmem:[%s168_s5] sm:$0xff]  ;;  %v27_v15 = vunpack.c.l.bf16 %v24_v8  ;;  %v28_v16 = vunpack.c.h.bf16 %v24_v8 }
   0x4   :  { %v45_v4 = vld [vmem:[%s169_s3] sm:$0xff] }
   0x5   :  { %v29_v5 = vld [vmem:[%s170_s1] sm:$0xff] }
   0x6   :  { %72 = vperm.xlu1 %93, %v69_v3   ;;  %v23_v7 = vld [vmem:[%s171_s0] sm:$0xff]  ;;  %v31_v9 = vunpack.c.l.bf16 %v29_v5  ;;  %v32_v10 = vunpack.c.h.bf16 %v29_v5 }
   0x7   :  { %48 = vperm.xlu0 %92, %v45_v4   ;;  %v25_v13 = vunpack.c.l.bf16 %v23_v7  ;;  %v26_v14 = vunpack.c.h.bf16 %v23_v7 }
  0x7d   :  { %v59_v18 = vpop.permute.xlu1 %58 }
  0x7e   :  { %v39_v17 = vpop.permute.xlu0 %38  ;;  %v61_v19 = vmul.f32 %v59_v18, %v31_v9  ;;  %v62_v20 = vmul.f32 %v59_v18, %v32_v10  ;;  %v63_v21 = vmul.f32 %v59_v18, %v33_v11  ;;  %v64_v22 = vmul.f32 %v59_v18, %v34_v12 }
  0x7f   :  { %v41_v23 = vmul.f32 %v39_v17, %v25_v13  ;;  %v42_v24 = vmul.f32 %v39_v17, %v26_v14  ;;  %v43_v25 = vmul.f32 %v39_v17, %v27_v15  ;;  %v44_v26 = vmul.f32 %v39_v17, %v28_v16 }
  0x81   :  { %v73_v36 = vpop.permute.xlu1 %72 }
  0x82   :  { %v49_v27 = vpop.permute.xlu0 %48 }
  0x83   :  { %v51_v28 = vadd.f32 %v49_v27, %v41_v23  ;;  %v52_v29 = vadd.f32 %v49_v27, %v42_v24  ;;  %v53_v30 = vadd.f32 %v49_v27, %v43_v25  ;;  %v54_v31 = vadd.f32 %v49_v27, %v44_v26 }
  0x85   :  { %v65_v32 = vadd.f32 %v61_v19, %v51_v28  ;;  %v66_v33 = vadd.f32 %v62_v20, %v52_v29  ;;  %v67_v34 = vadd.f32 %v63_v21, %v53_v30  ;;  %v68_v35 = vadd.f32 %v64_v22, %v54_v31 }
  0x87   :  { %v75_v37 = vadd.f32 %v73_v36, %v65_v32  ;;  %v76_v38 = vadd.f32 %v73_v36, %v66_v33  ;;  %v77_v39 = vadd.f32 %v73_v36, %v67_v34  ;;  %v78_v40 = vadd.f32 %v73_v36, %v68_v35 }
  0x89   :  { %v79_v41 = vmax.f32 %v75_v37, 0.0  ;;  %v80_v42 = vmax.f32 %v76_v38, 0.0  ;;  %v81_v43 = vmax.f32 %v77_v39, 0.0  ;;  %v82_v44 = vmax.f32 %v78_v40, 0.0 }
  0x8b   :  { %83 = vst [vmem:[%s172_s6] sm:$0xff] %v79_v41  ;;  %84 = vst [vmem:[%s172_s6 + $0x8] sm:$0xff] %v80_v42 }
  0x8c   :  { %85 = vst [vmem:[%s172_s6 + $0x10] sm:$0xff] %v81_v43  ;;  %86 = vst [vmem:[%s172_s6 + $0x18] sm:$0xff] %v82_v44 }

// kernel: dilated_res_block_forward.3
= control target key start
LH: loop header
LB: loop body
LE: loop exit
PB: predicated region body
PF: predicated region fallthrough
CT: control target
= control target key end

     0   :  { %v35_v0 = vlaneseq  ;;  %s711_s23 = smov 34   ;;  %s712_s24 = smov 16   ;;  %v719_v8 = vmov 0   ;;  %vm28_vm0 = vcmask 277504   ;;  %vm51_vm1 = vcmask 130048   ;;  %s932_s0 = inlined_call_operand.vmem [shape: f32[2,8,256], index: 0, kind: input, shape index: {}]   ;;  %s933_s1 = inlined_call_operand.vmem [shape: bf16[16,72], index: 1, kind: input, shape index: {}]   ;;  %s934_s2 = inlined_call_operand.vmem [shape: bf16[2,8,256], index: 2, kind: output, shape index: {0}]   ;;  %s935_s3 = inlined_call_operand.vmem [shape: bf16[2,8,256], index: 3, kind: output, shape index: {1}]   ;;  %s936_s4 = inlined_call_operand.vmem [shape: f32[1,8,4], index: 4, kind: output, shape index: {2}]  }
   0x1   :  { %v17_v1 = vld [vmem:[%s932_s0] sm:$0xff]  ;;  %v18_v2 = vld [vmem:[%s932_s0 + $0x8] sm:$0xff]  ;;  %v499_v3 = vld [vmem:[%s932_s0 + $0x10] sm:$0xff]  ;;  %s713_s25 = smov 32   ;;  %s714_s26 = smov 48   ;;  %359 = vmatprep.mubr.bf16.mxu0 %v719_v8  ;;  %402 = vmatprep.mubr.bf16.mxu1 %v719_v8  ;;  %vm53_vm2 = vcmask 261120  }
   0x2   :  { %v580_v4 = vpack.i.bf16 %v18_v2, %v17_v1  ;;  %v500_v5 = vld [vmem:[%s932_s0 + $0x18] sm:$0xff]  ;;  %v765_v6 = vand.u32 127, %v35_v0  ;;  %s715_s27 = smov 64   ;;  %s716_s0 = smov 80   ;;  %vm55_vm3 = vcmask 392192   ;;  %vm57_vm4 = vcmask 523264  }
   0x3   :  { %v585_v7 = vpack.i.bf16 %v500_v5, %v499_v3  ;;  %s717_s28 = smov 96   ;;  %s718_s29 = smov 112   ;;  %vm59_vm5 = vcmask 654336   ;;  %vm61_vm6 = vcmask 785408   ;;  %vm63_vm7 = vcmask 916480  }
   0x4   :  { %581 = vrot.lane.b32.xlu0 %v580_v4, %s711_s23  ;;  %37 = vrot.lane.b32.xlu1 %v765_v6, %s712_s24  ;;  %s720_s30 = smov 60   ;;  %s721_s5 = smov 62   ;;  %v68_v41 = vshrl.u32 %v35_v0, 7  ;;  %vm139_vm10 = vcmask 490496   ;;  %vm314_vm12 = vcmask 1043456   ;;  %vm174_vm13 = vcmask 506880  }
   0x5   :  { %s722_s6 = smov 92   ;;  %s723_s7 = smov 94   ;;  %vm726_vm15 = vmmov 1  }
   0x6   :  { %s724_s8 = smov 124   ;;  %s725_s9 = smov 126   ;;  %v69_v42 = vsub.s32 0, %v68_v41 }
   0x8   :  { %586 = vrot.lane.b32.xlu0 %v585_v7, %s711_s23  ;;  %39 = vrot.lane.b32.xlu1 %v765_v6, %s713_s25 }
   0xc   :  { %41 = vrot.lane.b32.xlu0 %v765_v6, %s714_s26  ;;  %43 = vrot.lane.b32.xlu1 %v765_v6, %s715_s27 }
  0x10   :  { %45 = vrot.lane.b32.xlu0 %v765_v6, %s716_s0  ;;  %47 = vrot.lane.b32.xlu1 %v765_v6, %s717_s28 }
  0x14   :  { %49 = vrot.lane.b32.xlu0 %v765_v6, %s718_s29 }
  0x76   :  { %v582_v9 = vpop.permute.xlu0 %581  ;;  %v38_v27 = vpop.permute.xlu1 %37 }
  0x77   :  { %v584_v10 = vunpack.i.h.bf16 %v582_v9  ;;  %v583_v11 = vunpack.i.l.bf16 %v582_v9  ;;  %v52_v28 = vsel %vm51_vm1, %v765_v6, %v38_v27  ;;  %vm114_vm1 = vcmask 752640  }
  0x79   :  { %v778_v12 = vsel %vm28_vm0, %v583_v11, %v584_v10  ;;  %v780_v13 = vsel %vm28_vm0, 0.0, %v583_v11  ;;  %v34_v18 = vsel %vm28_vm0, %v584_v10, 0.0 }
  0x7a   :  { %v587_v14 = vpop.permute.xlu0 %586  ;;  %v590_v15 = vpack.i.bf16 %v778_v12, %v780_v13  ;;  %v605_v24 = vpack.i.bf16 %v34_v18, %v778_v12  ;;  %v40_v29 = vpop.permute.xlu1 %39 }
  0x7b   :  { %v589_v16 = vunpack.i.h.bf16 %v587_v14  ;;  %v588_v17 = vunpack.i.l.bf16 %v587_v14  ;;  %v54_v30 = vsel %vm53_vm2, %v52_v28, %v40_v29  ;;  %vm163_vm2 = vcmask 769024  }
  0x7c   :  { %591 = vrot.lane.b32.xlu1 %v590_v15, %s720_s30 }
  0x7d   :  { %v190_v19 = vsel %vm28_vm0, %v589_v16, 0.0  ;;  %v784_v20 = vsel %vm28_vm0, %v588_v17, %v589_v16  ;;  %v786_v21 = vsel %vm28_vm0, 0.0, %v588_v17 }
  0x7e   :  { %v595_v22 = vpack.i.bf16 %v786_v21, %v34_v18  ;;  %v600_v23 = vpack.i.bf16 %v190_v19, %v784_v20  ;;  %v615_v25 = vpack.i.bf16 %v784_v20, %v780_v13  ;;  %v635_v26 = vpack.i.bf16 %v786_v21, %v190_v19  ;;  %v42_v31 = vpop.permute.xlu0 %41  ;;  %v44_v33 = vpop.permute.xlu1 %43 }
  0x7f   :  { %v56_v32 = vsel %vm55_vm3, %v54_v30, %v42_v31 }
  0x80   :  { %596 = vrot.lane.b32.xlu0 %v595_v22, %s720_s30  ;;  %601 = vrot.lane.b32.xlu1 %v600_v23, %s720_s30  ;;  %v58_v34 = vsel %vm57_vm4, %v56_v32, %v44_v33 }
  0x82   :  { %v46_v35 = vpop.permute.xlu0 %45  ;;  %v48_v37 = vpop.permute.xlu1 %47 }
  0x83   :  { %v60_v36 = vsel %vm59_vm5, %v58_v34, %v46_v35 }
  0x84   :  { %606 = vrot.lane.b32.xlu0 %v605_v24, %s715_s27  ;;  %611 = vrot.lane.b32.xlu1 %v605_v24, %s721_s5  ;;  %v62_v38 = vsel %vm61_vm6, %v60_v36, %v48_v37 }
  0x86   :  { %v50_v39 = vpop.permute.xlu0 %49 }
  0x87   :  { %v64_v40 = vsel %vm63_vm7, %v62_v38, %v50_v39  ;;  %vm152_vm7 = vcmask 1031168  }
  0x88   :  { %616 = vrot.lane.b32.xlu0 %v615_v25, %s715_s27  ;;  %621 = vrot.lane.b32.xlu1 %v615_v25, %s721_s5  ;;  %vm74_vm8 = vcmp.lt.s32.totalorder %v64_v40, 14  ;;  %vm65_vm9 = vcmp.ge.s32.totalorder %v64_v40, 2 }
  0x89   :  { %v75_v43 = vsel %vm74_vm8, 1, %v719_v8  ;;  %v66_v48 = vsel %vm65_vm9, 1, %v719_v8  ;;  %vm479_vm8 = vcmask 7168   ;;  %vm481_vm9 = vcmask 15360  }
  0x8a   :  { %v805_v44 = vrot.slane %v75_v43, %v69_v42  ;;  %v812_v57 = vrot.slane %v66_v48, %v69_v42 }
  0x8c   :  { %626 = vrot.lane.b32.xlu0 %v605_v24, %s722_s6  ;;  %631 = vrot.lane.b32.xlu1 %v605_v24, %s723_s7  ;;  %vm80_vm11 = vcmp.eq.s32.totalorder %v805_v44, 1  ;;  %vm71_vm14 = vcmp.eq.s32.totalorder %v812_v57, 1 }
  0x8d   :  { %vm833_vm0 = vmpackc.low %vm726_vm15, %vm71_vm14 }
  0x8e   :  { %vm848_vm3 = vmpackc.low %vm80_vm11, %vm726_vm15 }
  0x8f   :  { %vm872_vm5 = vmpackc.low %vm71_vm14, %vm80_vm11 }
  0x90   :  { %636 = vrot.lane.b32.xlu0 %v635_v26, %s715_s27  ;;  %641 = vrot.lane.b32.xlu1 %v635_v26, %s721_s5 }
  0x94   :  { %646 = vrot.lane.b32.xlu0 %v615_v25, %s722_s6  ;;  %651 = vrot.lane.b32.xlu1 %v615_v25, %s723_s7 }
  0x98   :  { %656 = vrot.lane.b32.xlu0 %v605_v24, %s724_s8  ;;  %661 = vrot.lane.b32.xlu1 %v605_v24, %s717_s28 }
  0x9c   :  { %666 = vrot.lane.b32.xlu0 %v635_v26, %s722_s6  ;;  %671 = vrot.lane.b32.xlu1 %v635_v26, %s723_s7 }
  0xa0   :  { %676 = vrot.lane.b32.xlu0 %v615_v25, %s724_s8  ;;  %681 = vrot.lane.b32.xlu1 %v615_v25, %s717_s28 }
  0xa4   :  { %686 = vrot.lane.b32.xlu0 %v605_v24, %s725_s9  ;;  %691 = vrot.lane.b32.xlu1 %v635_v26, %s724_s8 }
  0xa8   :  { %696 = vrot.lane.b32.xlu0 %v635_v26, %s717_s28  ;;  %701 = vrot.lane.b32.xlu1 %v615_v25, %s725_s9 }
  0xac   :  { %706 = vrot.lane.b32.xlu0 %v635_v26, %s725_s9 }
  0xee   :  { %v592_v45 = vpop.permute.xlu1 %591 }
  0xef   :  { %v594_v46 = vunpack.i.h.bf16 %v592_v45  ;;  %v593_v47 = vunpack.i.l.bf16 %v592_v45 }
  0xf1   :  { %v140_v49 = vsel %vm139_vm10, %v593_v47, %v594_v46 }
  0xf2   :  { %v597_v50 = vpop.permute.xlu0 %596  ;;  %v602_v51 = vpop.permute.xlu1 %601  ;;  %v144_v52 = vsel %vm80_vm11, %v140_v49, 0.0 }
  0xf3   :  { %v599_v53 = vunpack.i.h.bf16 %v597_v50  ;;  %v598_v54 = vunpack.i.l.bf16 %v597_v50  ;;  %v604_v55 = vunpack.i.h.bf16 %v602_v51  ;;  %v603_v56 = vunpack.i.l.bf16 %v602_v51 }
  0xf4   :  { %v301_v1 = vpack.c.bf16 %v144_v52, %v144_v52 }
  0xf5   :  { %v141_v58 = vsel %vm139_vm10, %v594_v46, %v598_v54  ;;  %v250_v59 = vsel %vm139_vm10, %v603_v56, %v604_v55  ;;  %v249_v60 = vsel %vm139_vm10, %v599_v53, %v603_v56  ;;  %vm483_vm10 = vcmask 23552  }
  0xf6   :  { %v607_v61 = vpop.permute.xlu0 %606  ;;  %v612_v62 = vpop.permute.xlu1 %611  ;;  %v145_v63 = vsel %vm80_vm11, %v141_v58, 0.0  ;;  %v254_v0 = vsel %vm80_vm11, %v250_v59, 0.0  ;;  %v253_v2 = vsel %vm80_vm11, %v249_v60, 0.0  ;;  %v316_v17 = vsel %vm314_vm12, %v301_v1, 0 }
  0xf7   :  { %v609_v3 = vunpack.i.h.bf16 %v607_v61  ;;  %v608_v4 = vunpack.i.l.bf16 %v607_v61  ;;  %v614_v5 = vunpack.i.h.bf16 %v612_v62  ;;  %v613_v6 = vunpack.i.l.bf16 %v612_v62 }
  0xf8   :  { %v302_v7 = vpack.c.bf16 %v145_v63, %v145_v63  ;;  %v304_v8 = vpack.c.bf16 %v254_v0, %v254_v0  ;;  %v303_v9 = vpack.c.bf16 %v253_v2, %v253_v2  ;;  %vm485_vm11 = vcmask 31744  }
  0xf9   :  { %v128_v10 = vsel %vm57_vm4, %v608_v4, %v609_v3  ;;  %v176_v11 = vsel %vm174_vm13, %v613_v6, %v614_v5 }
  0xfa   :  { %v504_v14 = vpack.c.bf16 %v176_v11, %v128_v10  ;;  %502 = vmatprep.subr.msk.bf16.mxu0 %vm314_vm12, %v302_v7  ;;  %528 = vmatprep.subr.msk.bf16.mxu1 %vm314_vm12, %v304_v8  ;;  %v617_v15 = vpop.permute.xlu0 %616  ;;  %v622_v16 = vpop.permute.xlu1 %621  ;;  %v322_v18 = vsel %vm314_vm12, %v303_v9, 0 }
  0xfb   :  { %v618_v22 = vunpack.i.l.bf16 %v617_v15  ;;  %v623_v23 = vunpack.i.l.bf16 %v622_v16  ;;  %334 = vmatpush1.bf16.msra.mxu0 %v316_v17  ;;  %377 = vmatpush1.bf16.msra.mxu1 %v322_v18  ;;  %v619_v35 = vunpack.i.h.bf16 %v617_v15  ;;  %v624_v36 = vunpack.i.h.bf16 %v622_v16 }
  0xfc   :  { %505 = vmatprep.subr.msk.bf16.mxu0 %vm833_vm0, %v504_v14 }
  0xfd   :  { %v127_v24 = vsel %vm57_vm4, %v618_v22, %v608_v4  ;;  %v175_v25 = vsel %vm174_vm13, %v623_v23, %v613_v6 }
  0xfe   :  { %v507_v26 = vpack.c.bf16 %v175_v25, %v127_v24  ;;  %v627_v27 = vpop.permute.xlu0 %626  ;;  %v632_v28 = vpop.permute.xlu1 %631 }
  0xff   :  { %v629_v29 = vunpack.i.h.bf16 %v627_v27  ;;  %v628_v30 = vunpack.i.l.bf16 %v627_v27  ;;  %v634_v31 = vunpack.i.h.bf16 %v632_v28  ;;  %v633_v32 = vunpack.i.l.bf16 %v632_v28 }
 0x100   :  { %508 = vmatpush1.bf16.msk.msra.mxu0 %vm833_vm0, %v507_v26 }
 0x101   :  { %v116_v33 = vsel %vm114_vm1, %v628_v30, %v629_v29  ;;  %v165_v34 = vsel %vm163_vm2, %v633_v32, %v634_v31 }
 0x102   :  { %v510_v37 = vpack.c.bf16 %v116_v33, %v165_v34  ;;  %v637_v38 = vpop.permute.xlu0 %636  ;;  %v642_v39 = vpop.permute.xlu1 %641 }
 0x103   :  { %v639_v40 = vunpack.i.h.bf16 %v637_v38  ;;  %v638_v41 = vunpack.i.l.bf16 %v637_v38  ;;  %v644_v42 = vunpack.i.h.bf16 %v642_v39  ;;  %v643_v43 = vunpack.i.l.bf16 %v642_v39 }
 0x104   :  { %511 = vmatprep.subr.msk.bf16.mxu0 %vm848_vm3, %v510_v37 }
 0x105   :  { %v237_v46 = vsel %vm57_vm4, %v639_v40, %v619_v35  ;;  %v238_v47 = vsel %vm57_vm4, %v619_v35, %v638_v41  ;;  %v281_v48 = vsel %vm174_vm13, %v644_v42, %v624_v36  ;;  %v282_v49 = vsel %vm174_vm13, %v624_v36, %v643_v43 }
 0x106   :  { %v530_v50 = vpack.c.bf16 %v282_v49, %v238_v47  ;;  %v533_v51 = vpack.c.bf16 %v281_v48, %v237_v46  ;;  %v647_v52 = vpop.permute.xlu0 %646  ;;  %v652_v53 = vpop.permute.xlu1 %651  ;;  %vm89_vm4 = vcmask 1014784  }
 0x107   :  { %v648_v54 = vunpack.i.l.bf16 %v647_v52  ;;  %v653_v55 = vunpack.i.l.bf16 %v652_v53  ;;  %v649_v4 = vunpack.i.h.bf16 %v647_v52  ;;  %v654_v5 = vunpack.i.h.bf16 %v652_v53 }
 0x108   :  { %531 = vmatprep.subr.msk.bf16.mxu1 %vm833_vm0, %v530_v50 }
 0x109   :  { %v115_v56 = vsel %vm114_vm1, %v648_v54, %v628_v30  ;;  %v164_v58 = vsel %vm163_vm2, %v653_v55, %v633_v32  ;;  %534 = vmatpush1.bf16.msk.msra.mxu1 %vm833_vm0, %v533_v51 }
 0x10a   :  { %v513_v59 = vpack.c.bf16 %v115_v56, %v164_v58  ;;  %v657_v60 = vpop.permute.xlu0 %656  ;;  %v662_v61 = vpop.permute.xlu1 %661  ;;  %v710_v58 = vld [vmem:[%s933_s1] sm:$0xff]  }
 0x10b   :  { %v659_v62 = vunpack.i.h.bf16 %v657_v60  ;;  %v658_v63 = vunpack.i.l.bf16 %v657_v60  ;;  %v664_v0 = vunpack.i.h.bf16 %v662_v61  ;;  %v663_v1 = vunpack.i.l.bf16 %v662_v61 }
 0x10c   :  { %514 = vmatpush1.bf16.msk.msra.mxu0 %vm848_vm3, %v513_v59 }
 0x10d   :  { %v91_v2 = vsel %vm89_vm4, %v658_v63, %v659_v62  ;;  %v103_v3 = vsel %vm61_vm6, %v663_v1, %v664_v0 }
 0x10e   :  { %v516_v6 = vpack.c.bf16 %v103_v3, %v91_v2  ;;  %v667_v7 = vpop.permute.xlu0 %666  ;;  %v672_v8 = vpop.permute.xlu1 %671 }
 0x10f   :  { %v669_v9 = vunpack.i.h.bf16 %v667_v7  ;;  %v668_v10 = vunpack.i.l.bf16 %v667_v7  ;;  %v674_v11 = vunpack.i.h.bf16 %v672_v8  ;;  %v673_v14 = vunpack.i.l.bf16 %v672_v8 }
 0x110   :  { %517 = vmatprep.subr.msk.bf16.mxu0 %vm872_vm5, %v516_v6 }
 0x111   :  { %v225_v16 = vsel %vm114_vm1, %v669_v9, %v649_v4  ;;  %v226_v17 = vsel %vm114_vm1, %v649_v4, %v668_v10  ;;  %v271_v18 = vsel %vm163_vm2, %v674_v11, %v654_v5  ;;  %v272_v22 = vsel %vm163_vm2, %v654_v5, %v673_v14 }
 0x112   :  { %v536_v23 = vpack.c.bf16 %v226_v17, %v272_v22  ;;  %v539_v24 = vpack.c.bf16 %v225_v16, %v271_v18  ;;  %v677_v44 = vpop.permute.xlu0 %676  ;;  %v682_v25 = vpop.permute.xlu1 %681 }
 0x113   :  { %v678_v57 = vunpack.i.l.bf16 %v677_v44  ;;  %v683_v26 = vunpack.i.l.bf16 %v682_v25  ;;  %v679_v37 = vunpack.i.h.bf16 %v677_v44  ;;  %v684_v41 = vunpack.i.h.bf16 %v682_v25 }
 0x114   :  { %537 = vmatprep.subr.msk.bf16.mxu1 %vm848_vm3, %v536_v23 }
 0x115   :  { %v90_v27 = vsel %vm89_vm4, %v678_v57, %v658_v63  ;;  %v102_v28 = vsel %vm61_vm6, %v683_v26, %v663_v1  ;;  %540 = vmatpush1.bf16.msk.msra.mxu1 %vm848_vm3, %v539_v24 }
 0x116   :  { %v519_v29 = vpack.c.bf16 %v102_v28, %v90_v27  ;;  %v687_v30 = vpop.permute.xlu0 %686  ;;  %v692_v31 = vpop.permute.xlu1 %691 }
 0x117   :  { %v689_v32 = vunpack.i.h.bf16 %v687_v30  ;;  %v688_v33 = vunpack.i.l.bf16 %v687_v30  ;;  %v694_v34 = vunpack.i.h.bf16 %v692_v31  ;;  %v693_v36 = vunpack.i.l.bf16 %v692_v31 }
 0x118   :  { %520 = vmatpush1.bf16.msk.msra.mxu0 %vm872_vm5, %v519_v29 }
 0x119   :  { %v154_v35 = vsel %vm152_vm7, %v688_v33, %v689_v32  ;;  %v201_v46 = vsel %vm89_vm4, %v694_v34, %v679_v37  ;;  %v202_v47 = vsel %vm89_vm4, %v679_v37, %v693_v36 }
 0x11a   :  { %v522_v38 = vpack.c.bf16 %v154_v35, %v778_v12  ;;  %v697_v39 = vpop.permute.xlu0 %696  ;;  %v702_v40 = vpop.permute.xlu1 %701 }
 0x11b   :  { %v699_v42 = vunpack.i.h.bf16 %v697_v39  ;;  %v698_v43 = vunpack.i.l.bf16 %v697_v39  ;;  %v703_v45 = vunpack.i.l.bf16 %v702_v40  ;;  %v704_v54 = vunpack.i.h.bf16 %v702_v40 }
 0x11c   :  { %523 = vmatprep.subr.msk.bf16.mxu0 %vm833_vm0, %v522_v38 }
 0x11d   :  { %v213_v48 = vsel %vm61_vm6, %v699_v42, %v684_v41  ;;  %v214_v49 = vsel %vm61_vm6, %v684_v41, %v698_v43  ;;  %v153_v50 = vsel %vm152_vm7, %v703_v45, %v688_v33  ;;  %vm310_vm6 = vcmask 588800  }
 0x11e   :  { %v542_v12 = vpack.c.bf16 %v214_v49, %v202_v47  ;;  %v545_v51 = vpack.c.bf16 %v213_v48, %v201_v46  ;;  %v525_v52 = vpack.c.bf16 %v153_v50, %v780_v13  ;;  %v707_v53 = vpop.permute.xlu0 %706 }
 0x11f   :  { %v709_v55 = vunpack.i.h.bf16 %v707_v53  ;;  %v708_v56 = vunpack.i.l.bf16 %v707_v53 }
 0x120   :  { %526 = vmatpush1.bf16.msk.msra.mxu0 %vm833_vm0, %v525_v52  ;;  %543 = vmatprep.subr.msk.bf16.mxu1 %vm872_vm5, %v542_v12 }
 0x121   :  { %v261_v59 = vsel %vm152_vm7, %v709_v55, %v704_v54  ;;  %v262_v60 = vsel %vm152_vm7, %v704_v54, %v708_v56  ;;  %546 = vmatpush1.bf16.msk.msra.mxu1 %vm872_vm5, %v545_v51 }
 0x122   :  { %v548_v13 = vpack.c.bf16 %v262_v60, %v784_v20  ;;  %v551_v61 = vpack.c.bf16 %v261_v59, %v786_v21 }
 0x123   :  { %527 = vmatmul.mubr.msk.bf16.vlgmr.msra.gmra.mxu0 %vm310_vm6, %v710_v58 }
 0x124   :  { %549 = vmatprep.subr.msk.bf16.mxu1 %vm833_vm0, %v548_v13 }
 0x125   :  { %552 = vmatpush1.bf16.msk.msra.mxu1 %vm833_vm0, %v551_v61 }
 0x128   :  { %553 = vmatmul.mubr.msk.bf16.vlgmr.msra.gmra.mxu1 %vm310_vm6, %v710_v58 }
 0x1e3   :  { %v361_v62 = vpop.f32.mrf.mxu0 }
 0x1e4   :  { %v456_v63 = vmul.f32 %v361_v62, %v361_v62 }
 0x1e5   :  { %v363_v0 = vpop.f32.mrf.mxu0 }
 0x1e6   :  { %v560_v1 = vpack.c.bf16 %v363_v0, %v361_v62  ;;  %v451_v2 = vadd.f32 %v363_v0, %v361_v62  ;;  %v457_v3 = vmul.f32 %v363_v0, %v363_v0 }
 0x1e7   :  { %v365_v4 = vpop.f32.mrf.mxu0 }
 0x1e8   :  { %421 = vst [vmem:[%s934_s2] sm:$0xff] %v560_v1  ;;  %v404_v20 = vpop.f32.mrf.mxu1  ;;  %v460_v21 = vadd.f32 %v457_v3, %v456_v63  ;;  %v470_v8 = vmul.f32 %v365_v4, %v365_v4 }
 0x1e9   :  { %v458_v5 = vmul.f32 %v404_v20, %v404_v20  ;;  %v367_v6 = vpop.f32.mrf.mxu0  ;;  %v452_v7 = vadd.f32 %v451_v2, %v404_v20 }
 0x1ea   :  { %v562_v19 = vpack.c.bf16 %v367_v6, %v365_v4  ;;  %v465_v9 = vadd.f32 %v367_v6, %v365_v4  ;;  %v471_v10 = vmul.f32 %v367_v6, %v367_v6  ;;  %v406_v11 = vpop.f32.mrf.mxu1 }
 0x1eb   :  { %v561_v14 = vpack.c.bf16 %v406_v11, %v404_v20  ;;  %v453_v15 = vadd.f32 %v452_v7, %v406_v11  ;;  %v459_v16 = vmul.f32 %v406_v11, %v406_v11  ;;  %v461_v17 = vadd.f32 %v460_v21, %v458_v5 }
 0x1ec   :  { %440 = vst [vmem:[%s935_s3] sm:$0xff] %v562_v19  ;;  %v474_v18 = vadd.f32 %v471_v10, %v470_v8  ;;  %v408_v22 = vpop.f32.mrf.mxu1 }
 0x1ed   :  { %556 = vst [vmem:[%s934_s2 + $0x8] sm:$0xff] %v561_v14  ;;  %v472_v23 = vmul.f32 %v408_v22, %v408_v22  ;;  %454 = vadd.xlane.f32.xlu1 %v453_v15  ;;  %v462_v24 = vadd.f32 %v461_v17, %v459_v16  ;;  %v466_v44 = vadd.f32 %v465_v9, %v408_v22 }
 0x1ee   :  { %v410_v25 = vpop.f32.mrf.mxu1 }
 0x1ef   :  { %v563_v57 = vpack.c.bf16 %v410_v25, %v408_v22  ;;  %v473_v26 = vmul.f32 %v410_v25, %v410_v25  ;;  %463 = vadd.xlane.f32.xlu0 %v462_v24  ;;  %v475_v27 = vadd.f32 %v474_v18, %v472_v23  ;;  %v467_v29 = vadd.f32 %v466_v44, %v410_v25 }
 0x1f1   :  { %559 = vst [vmem:[%s935_s3 + $0x8] sm:$0xff] %v563_v57  ;;  %v476_v28 = vadd.f32 %v475_v27, %v473_v26 }
 0x1f3   :  { %477 = vadd.xlane.f32.xlu1 %v476_v28  ;;  %468 = vadd.xlane.f32.xlu0 %v467_v29 }
 0x276   :  { %v455_v30 = vpop.xlane.xlu1 %454 }
 0x278   :  { %v464_v31 = vpop.xlane.xlu0 %463 }
 0x279   :  { %v480_v32 = vsel %vm479_vm8, %v455_v30, %v464_v31 }
 0x27c   :  { %v478_v33 = vpop.xlane.xlu1 %477  ;;  %v469_v34 = vpop.xlane.xlu0 %468 }
 0x27d   :  { %v482_v35 = vsel %vm481_vm9, %v480_v32, %v469_v34 }
 0x27e   :  { %v484_v36 = vsel %vm483_vm10, %v482_v35, %v478_v33 }
 0x27f   :  { %486 = vst.msk [vmem:[%s936_s4] sm:$0xff] %vm485_vm11, %v484_v36 }

// kernel: dilated_res_block_forward.4
= control target key start
LH: loop header
LB: loop body
LE: loop exit
PB: predicated region body
PF: predicated region fallthrough
CT: control target
= control target key end

     0   :  { %v684_v0 = vmov 0   ;;  %v65_v3 = vlaneseq  ;;  %s685_s22 = smov 16   ;;  %s686_s23 = smov 48   ;;  %vm58_vm0 = vcmask 277504   ;;  %vm81_vm1 = vcmask 130048   ;;  %s905_s1 = inlined_call_operand.vmem [shape: f32[8,1], index: 1, kind: input, shape index: {}]   ;;  %s906_s2 = inlined_call_operand.vmem [shape: f32[8,1], index: 2, kind: input, shape index: {}]   ;;  %s907_s0 = inlined_call_operand.vmem [shape: bf16[2,8,256], index: 0, kind: input, shape index: {}]   ;;  %s908_s3 = inlined_call_operand.vmem [shape: bf16[8,72], index: 3, kind: input, shape index: {}]   ;;  %s909_s4 = inlined_call_operand.vmem [shape: bf16[2,8,256], index: 4, kind: output, shape index: {0}]   ;;  %s910_s5 = inlined_call_operand.vmem [shape: f32[1,8,2], index: 5, kind: output, shape index: {1}]  }
   0x1   :  { %553 = vset.pattern.permute.xlu0 %v684_v0  ;;  %v20_v1 = vld [vmem:[%s905_s1] sm:$0xff]  ;;  %384 = vmatprep.mubr.bf16.mxu0 %v684_v0  ;;  %s687_s1 = smov 80   ;;  %s688_s24 = smov 112   ;;  %v479_v6 = vld [vmem:[%s907_s0 + $0x8] sm:$0xff]  ;;  %vm83_vm2 = vcmask 261120   ;;  %vm85_vm3 = vcmask 392192  }
   0x2   :  { %28 = vperm.xlu0 %553, %v20_v1   ;;  %425 = vmatprep.mubr.bf16.mxu1 %v684_v0  ;;  %v21_v2 = vld [vmem:[%s906_s2] sm:$0xff]  ;;  %v740_v4 = vand.u32 127, %v65_v3  ;;  %v44_v9 = vunpack.c.l.bf16 %v479_v6  ;;  %v45_v10 = vunpack.c.h.bf16 %v479_v6  ;;  %s690_s28 = smov 32   ;;  %s691_s29 = smov 64   ;;  %vm87_vm4 = vcmask 523264  }
   0x3   :  { %v23_v5 = vld [vmem:[%s907_s0] sm:$0xff]  ;;  %s689_s0 = smov 34   ;;  %s692_s30 = smov 96   ;;  %vm89_vm5 = vcmask 654336   ;;  %vm91_vm6 = vcmask 785408   ;;  %vm93_vm7 = vcmask 916480  }
   0x4   :  { %v24_v7 = vunpack.c.l.bf16 %v23_v5  ;;  %v25_v8 = vunpack.c.h.bf16 %v23_v5  ;;  %s693_s6 = smov 60   ;;  %s694_s7 = smov 62   ;;  %v98_v59 = vshrl.u32 %v65_v3, 7  ;;  %vm169_vm10 = vcmask 490496  }
   0x5   :  { %s695_s8 = smov 92   ;;  %s696_s9 = smov 94   ;;  %vm339_vm12 = vcmask 1043456   ;;  %vm204_vm13 = vcmask 506880   ;;  %vm699_vm15 = vmmov 1  }
   0x6   :  { %35 = vperm.xlu0 %553, %v21_v2   ;;  %s697_s10 = smov 124   ;;  %s698_s11 = smov 126   ;;  %v99_v60 = vsub.s32 0, %v98_v59 }
   0xa   :  { %67 = vrot.lane.b32.xlu0 %v740_v4, %s685_s22 }
   0xe   :  { %71 = vrot.lane.b32.xlu0 %v740_v4, %s686_s23 }
  0x12   :  { %75 = vrot.lane.b32.xlu0 %v740_v4, %s687_s1 }
  0x16   :  { %79 = vrot.lane.b32.xlu0 %v740_v4, %s688_s24 }
  0x7d   :  { %v29_v11 = vpop.permute.xlu0 %28 }
  0x7e   :  { %v31_v12 = vmul.f32 %v29_v11, %v24_v7  ;;  %v32_v13 = vmul.f32 %v29_v11, %v25_v8  ;;  %v46_v14 = vmul.f32 %v44_v9, %v29_v11  ;;  %v47_v15 = vmul.f32 %v45_v10, %v29_v11 }
  0x81   :  { %v36_v16 = vpop.permute.xlu0 %35 }
  0x82   :  { %v48_v17 = vadd.f32 %v46_v14, %v36_v16  ;;  %v49_v18 = vadd.f32 %v47_v15, %v36_v16  ;;  %v38_v19 = vadd.f32 %v36_v16, %v31_v12  ;;  %v39_v20 = vadd.f32 %v36_v16, %v32_v13 }
  0x84   :  { %v40_v21 = vmax.f32 %v38_v19, 0.0  ;;  %v41_v22 = vmax.f32 %v39_v20, 0.0  ;;  %v50_v24 = vmax.f32 %v48_v17, 0.0  ;;  %v51_v25 = vmax.f32 %v49_v18, 0.0 }
  0x85   :  { %v68_v45 = vpop.permute.xlu0 %67 }
  0x86   :  { %v554_v23 = vpack.i.bf16 %v41_v22, %v40_v21  ;;  %v559_v26 = vpack.i.bf16 %v51_v25, %v50_v24  ;;  %v82_v46 = vsel %vm81_vm1, %v740_v4, %v68_v45  ;;  %vm144_vm1 = vcmask 752640  }
  0x88   :  { %555 = vrot.lane.b32.xlu1 %v554_v23, %s689_s0 }
  0x89   :  { %v72_v49 = vpop.permute.xlu0 %71 }
  0x8c   :  { %560 = vrot.lane.b32.xlu1 %v559_v26, %s689_s0 }
  0x8d   :  { %v76_v53 = vpop.permute.xlu0 %75 }
  0x90   :  { %69 = vrot.lane.b32.xlu1 %v740_v4, %s690_s28 }
  0x91   :  { %v80_v57 = vpop.permute.xlu0 %79 }
  0x94   :  { %73 = vrot.lane.b32.xlu1 %v740_v4, %s691_s29 }
  0x98   :  { %77 = vrot.lane.b32.xlu1 %v740_v4, %s692_s30 }
  0xfa   :  { %v556_v27 = vpop.permute.xlu1 %555 }
  0xfb   :  { %v558_v28 = vunpack.i.h.bf16 %v556_v27  ;;  %v557_v29 = vunpack.i.l.bf16 %v556_v27 }
  0xfd   :  { %v757_v30 = vsel %vm58_vm0, %v557_v29, %v558_v28  ;;  %v759_v31 = vsel %vm58_vm0, 0.0, %v557_v29  ;;  %v64_v36 = vsel %vm58_vm0, %v558_v28, 0.0 }
  0xfe   :  { %v561_v32 = vpop.permute.xlu1 %560  ;;  %v564_v33 = vpack.i.bf16 %v757_v30, %v759_v31  ;;  %v579_v42 = vpack.i.bf16 %v64_v36, %v757_v30 }
  0xff   :  { %v563_v34 = vunpack.i.h.bf16 %v561_v32  ;;  %v562_v35 = vunpack.i.l.bf16 %v561_v32 }
 0x100   :  { %565 = vrot.lane.b32.xlu1 %v564_v33, %s693_s6 }
 0x101   :  { %v220_v37 = vsel %vm58_vm0, %v563_v34, 0.0  ;;  %v763_v38 = vsel %vm58_vm0, %v562_v35, %v563_v34  ;;  %v765_v39 = vsel %vm58_vm0, 0.0, %v562_v35 }
 0x102   :  { %v569_v40 = vpack.i.bf16 %v765_v39, %v64_v36  ;;  %v574_v41 = vpack.i.bf16 %v220_v37, %v763_v38  ;;  %v589_v43 = vpack.i.bf16 %v763_v38, %v759_v31  ;;  %v609_v44 = vpack.i.bf16 %v765_v39, %v220_v37  ;;  %v70_v47 = vpop.permute.xlu1 %69 }
 0x103   :  { %v84_v48 = vsel %vm83_vm2, %v82_v46, %v70_v47  ;;  %vm193_vm2 = vcmask 769024  }
 0x104   :  { %570 = vrot.lane.b32.xlu0 %v569_v40, %s693_s6  ;;  %575 = vrot.lane.b32.xlu1 %v574_v41, %s693_s6  ;;  %v86_v50 = vsel %vm85_vm3, %v84_v48, %v72_v49 }
 0x106   :  { %v74_v51 = vpop.permute.xlu1 %73 }
 0x107   :  { %v88_v52 = vsel %vm87_vm4, %v86_v50, %v74_v51 }
 0x108   :  { %580 = vrot.lane.b32.xlu0 %v579_v42, %s691_s29  ;;  %585 = vrot.lane.b32.xlu1 %v579_v42, %s694_s7  ;;  %v90_v54 = vsel %vm89_vm5, %v88_v52, %v76_v53 }
 0x10a   :  { %v78_v55 = vpop.permute.xlu1 %77 }
 0x10b   :  { %v92_v56 = vsel %vm91_vm6, %v90_v54, %v78_v55 }
 0x10c   :  { %590 = vrot.lane.b32.xlu0 %v589_v43, %s691_s29  ;;  %595 = vrot.lane.b32.xlu1 %v589_v43, %s694_s7  ;;  %v94_v58 = vsel %vm93_vm7, %v92_v56, %v80_v57  ;;  %vm182_vm7 = vcmask 1031168  }
 0x10d   :  { %vm104_vm8 = vcmp.lt.s32.totalorder %v94_v58, 14  ;;  %vm95_vm9 = vcmp.ge.s32.totalorder %v94_v58, 2 }
 0x10e   :  { %v105_v61 = vsel %vm104_vm8, 1, %v684_v0  ;;  %v96_v4 = vsel %vm95_vm9, 1, %v684_v0  ;;  %vm467_vm8 = vcmask 7168   ;;  %vm469_vm9 = vcmask 15360  }
 0x10f   :  { %v784_v62 = vrot.slane %v105_v61, %v99_v60  ;;  %v791_v12 = vrot.slane %v96_v4, %v99_v60 }
 0x110   :  { %600 = vrot.lane.b32.xlu0 %v579_v42, %s695_s8  ;;  %605 = vrot.lane.b32.xlu1 %v579_v42, %s696_s9 }
 0x111   :  { %vm110_vm11 = vcmp.eq.s32.totalorder %v784_v62, 1  ;;  %vm101_vm14 = vcmp.eq.s32.totalorder %v791_v12, 1 }
 0x112   :  { %vm812_vm0 = vmpackc.low %vm699_vm15, %vm101_vm14 }
 0x113   :  { %vm827_vm3 = vmpackc.low %vm110_vm11, %vm699_vm15 }
 0x114   :  { %610 = vrot.lane.b32.xlu0 %v609_v44, %s691_s29  ;;  %615 = vrot.lane.b32.xlu1 %v609_v44, %s694_s7  ;;  %vm851_vm5 = vmpackc.low %vm101_vm14, %vm110_vm11 }
 0x118   :  { %620 = vrot.lane.b32.xlu0 %v589_v43, %s695_s8  ;;  %625 = vrot.lane.b32.xlu1 %v589_v43, %s696_s9 }
 0x11c   :  { %630 = vrot.lane.b32.xlu0 %v579_v42, %s697_s10  ;;  %635 = vrot.lane.b32.xlu1 %v579_v42, %s692_s30 }
 0x120   :  { %640 = vrot.lane.b32.xlu0 %v609_v44, %s695_s8  ;;  %645 = vrot.lane.b32.xlu1 %v609_v44, %s696_s9 }
 0x124   :  { %650 = vrot.lane.b32.xlu0 %v589_v43, %s697_s10  ;;  %655 = vrot.lane.b32.xlu1 %v589_v43, %s692_s30 }
 0x128   :  { %660 = vrot.lane.b32.xlu0 %v579_v42, %s698_s11  ;;  %665 = vrot.lane.b32.xlu1 %v609_v44, %s697_s10 }
 0x12c   :  { %670 = vrot.lane.b32.xlu0 %v609_v44, %s692_s30  ;;  %675 = vrot.lane.b32.xlu1 %v589_v43, %s698_s11 }
 0x130   :  { %680 = vrot.lane.b32.xlu0 %v609_v44, %s698_s11 }
 0x172   :  { %v566_v63 = vpop.permute.xlu1 %565 }
 0x173   :  { %v568_v1 = vunpack.i.h.bf16 %v566_v63  ;;  %v567_v2 = vunpack.i.l.bf16 %v566_v63 }
 0x175   :  { %v170_v5 = vsel %vm169_vm10, %v567_v2, %v568_v1 }
 0x176   :  { %v571_v6 = vpop.permute.xlu0 %570  ;;  %v576_v7 = vpop.permute.xlu1 %575  ;;  %v174_v3 = vsel %vm110_vm11, %v170_v5, 0.0 }
 0x177   :  { %v573_v8 = vunpack.i.h.bf16 %v571_v6  ;;  %v572_v9 = vunpack.i.l.bf16 %v571_v6  ;;  %v578_v10 = vunpack.i.h.bf16 %v576_v7  ;;  %v577_v11 = vunpack.i.l.bf16 %v576_v7 }
 0x178   :  { %v331_v19 = vpack.c.bf16 %v174_v3, %v174_v3 }
 0x179   :  { %v171_v13 = vsel %vm169_vm10, %v568_v1, %v572_v9  ;;  %v280_v0 = vsel %vm169_vm10, %v577_v11, %v578_v10  ;;  %v279_v14 = vsel %vm169_vm10, %v573_v8, %v577_v11 }
 0x17a   :  { %v581_v15 = vpop.permute.xlu0 %580  ;;  %v586_v16 = vpop.permute.xlu1 %585  ;;  %v175_v17 = vsel %vm110_vm11, %v171_v13, 0.0  ;;  %v284_v18 = vsel %vm110_vm11, %v280_v0, 0.0  ;;  %v283_v20 = vsel %vm110_vm11, %v279_v14, 0.0  ;;  %v341_v35 = vsel %vm339_vm12, %v331_v19, 0 }
 0x17b   :  { %v583_v21 = vunpack.i.h.bf16 %v581_v15  ;;  %v582_v22 = vunpack.i.l.bf16 %v581_v15  ;;  %v588_v23 = vunpack.i.h.bf16 %v586_v16  ;;  %v587_v24 = vunpack.i.l.bf16 %v586_v16 }
 0x17c   :  { %v332_v25 = vpack.c.bf16 %v175_v17, %v175_v17  ;;  %v334_v26 = vpack.c.bf16 %v284_v18, %v284_v18  ;;  %v333_v27 = vpack.c.bf16 %v283_v20, %v283_v20 }
 0x17d   :  { %v158_v28 = vsel %vm87_vm4, %v582_v22, %v583_v21  ;;  %v206_v29 = vsel %vm204_vm13, %v587_v24, %v588_v23 }
 0x17e   :  { %v482_v32 = vpack.c.bf16 %v206_v29, %v158_v28  ;;  %480 = vmatprep.subr.msk.bf16.mxu0 %vm339_vm12, %v332_v25  ;;  %506 = vmatprep.subr.msk.bf16.mxu1 %vm339_vm12, %v334_v26  ;;  %v591_v33 = vpop.permute.xlu0 %590  ;;  %v596_v34 = vpop.permute.xlu1 %595  ;;  %v347_v36 = vsel %vm339_vm12, %v333_v27, 0 }
 0x17f   :  { %v592_v40 = vunpack.i.l.bf16 %v591_v33  ;;  %v597_v41 = vunpack.i.l.bf16 %v596_v34  ;;  %359 = vmatpush1.bf16.msra.mxu0 %v341_v35  ;;  %400 = vmatpush1.bf16.msra.mxu1 %v347_v36  ;;  %v593_v53 = vunpack.i.h.bf16 %v591_v33  ;;  %v598_v54 = vunpack.i.h.bf16 %v596_v34 }
 0x180   :  { %483 = vmatprep.subr.msk.bf16.mxu0 %vm812_vm0, %v482_v32 }
 0x181   :  { %v157_v42 = vsel %vm87_vm4, %v592_v40, %v582_v22  ;;  %v205_v43 = vsel %vm204_vm13, %v597_v41, %v587_v24 }
 0x182   :  { %v485_v44 = vpack.c.bf16 %v205_v43, %v157_v42  ;;  %v601_v45 = vpop.permute.xlu0 %600  ;;  %v606_v46 = vpop.permute.xlu1 %605 }
 0x183   :  { %v603_v47 = vunpack.i.h.bf16 %v601_v45  ;;  %v602_v48 = vunpack.i.l.bf16 %v601_v45  ;;  %v608_v49 = vunpack.i.h.bf16 %v606_v46  ;;  %v607_v50 = vunpack.i.l.bf16 %v606_v46 }
 0x184   :  { %486 = vmatpush1.bf16.msk.msra.mxu0 %vm812_vm0, %v485_v44 }
 0x185   :  { %v146_v51 = vsel %vm144_vm1, %v602_v48, %v603_v47  ;;  %v195_v52 = vsel %vm193_vm2, %v607_v50, %v608_v49 }
 0x186   :  { %v488_v55 = vpack.c.bf16 %v146_v51, %v195_v52  ;;  %v611_v56 = vpop.permute.xlu0 %610  ;;  %v616_v57 = vpop.permute.xlu1 %615 }
 0x187   :  { %v613_v58 = vunpack.i.h.bf16 %v611_v56  ;;  %v612_v59 = vunpack.i.l.bf16 %v611_v56  ;;  %v618_v60 = vunpack.i.h.bf16 %v616_v57  ;;  %v617_v61 = vunpack.i.l.bf16 %v616_v57 }
 0x188   :  { %489 = vmatprep.subr.msk.bf16.mxu0 %vm827_vm3, %v488_v55 }
 0x189   :  { %v267_v1 = vsel %vm87_vm4, %v613_v58, %v593_v53  ;;  %v268_v2 = vsel %vm87_vm4, %v593_v53, %v612_v59  ;;  %v311_v4 = vsel %vm204_vm13, %v618_v60, %v598_v54  ;;  %v312_v5 = vsel %vm204_vm13, %v598_v54, %v617_v61 }
 0x18a   :  { %v508_v6 = vpack.c.bf16 %v312_v5, %v268_v2  ;;  %v511_v7 = vpack.c.bf16 %v311_v4, %v267_v1  ;;  %v621_v3 = vpop.permute.xlu0 %620  ;;  %v626_v8 = vpop.permute.xlu1 %625  ;;  %vm119_vm4 = vcmask 1014784  }
 0x18b   :  { %v622_v9 = vunpack.i.l.bf16 %v621_v3  ;;  %v627_v10 = vunpack.i.l.bf16 %v626_v8  ;;  %v623_v22 = vunpack.i.h.bf16 %v621_v3  ;;  %v628_v23 = vunpack.i.h.bf16 %v626_v8 }
 0x18c   :  { %509 = vmatprep.subr.msk.bf16.mxu1 %vm812_vm0, %v508_v6 }
 0x18d   :  { %v145_v11 = vsel %vm144_vm1, %v622_v9, %v602_v48  ;;  %v194_v13 = vsel %vm193_vm2, %v627_v10, %v607_v50  ;;  %512 = vmatpush1.bf16.msk.msra.mxu1 %vm812_vm0, %v511_v7 }
 0x18e   :  { %v491_v0 = vpack.c.bf16 %v145_v11, %v194_v13  ;;  %v631_v14 = vpop.permute.xlu0 %630  ;;  %v636_v15 = vpop.permute.xlu1 %635  ;;  %v22_v13 = vld [vmem:[%s908_s3] sm:$0xf] }
 0x18f   :  { %v633_v16 = vunpack.i.h.bf16 %v631_v14  ;;  %v632_v17 = vunpack.i.l.bf16 %v631_v14  ;;  %v638_v18 = vunpack.i.h.bf16 %v636_v15  ;;  %v637_v19 = vunpack.i.l.bf16 %v636_v15 }
 0x190   :  { %492 = vmatpush1.bf16.msk.msra.mxu0 %vm827_vm3, %v491_v0 }
 0x191   :  { %v121_v20 = vsel %vm119_vm4, %v632_v17, %v633_v16  ;;  %v133_v21 = vsel %vm91_vm6, %v637_v19, %v638_v18 }
 0x192   :  { %v494_v24 = vpack.c.bf16 %v133_v21, %v121_v20  ;;  %v641_v25 = vpop.permute.xlu0 %640  ;;  %v646_v26 = vpop.permute.xlu1 %645 }
 0x193   :  { %v643_v27 = vunpack.i.h.bf16 %v641_v25  ;;  %v642_v28 = vunpack.i.l.bf16 %v641_v25  ;;  %v648_v29 = vunpack.i.h.bf16 %v646_v26  ;;  %v647_v32 = vunpack.i.l.bf16 %v646_v26 }
 0x194   :  { %495 = vmatprep.subr.msk.bf16.mxu0 %vm851_vm5, %v494_v24 }
 0x195   :  { %v255_v34 = vsel %vm144_vm1, %v643_v27, %v623_v22  ;;  %v256_v35 = vsel %vm144_vm1, %v623_v22, %v642_v28  ;;  %v301_v36 = vsel %vm193_vm2, %v648_v29, %v628_v23  ;;  %v302_v40 = vsel %vm193_vm2, %v628_v23, %v647_v32 }
 0x196   :  { %v514_v41 = vpack.c.bf16 %v256_v35, %v302_v40  ;;  %v517_v42 = vpack.c.bf16 %v255_v34, %v301_v36  ;;  %v651_v62 = vpop.permute.xlu0 %650  ;;  %v656_v43 = vpop.permute.xlu1 %655 }
 0x197   :  { %v652_v12 = vunpack.i.l.bf16 %v651_v62  ;;  %v657_v44 = vunpack.i.l.bf16 %v656_v43  ;;  %v653_v55 = vunpack.i.h.bf16 %v651_v62  ;;  %v658_v59 = vunpack.i.h.bf16 %v656_v43 }
 0x198   :  { %515 = vmatprep.subr.msk.bf16.mxu1 %vm827_vm3, %v514_v41 }
 0x199   :  { %v120_v45 = vsel %vm119_vm4, %v652_v12, %v632_v17  ;;  %v132_v46 = vsel %vm91_vm6, %v657_v44, %v637_v19  ;;  %518 = vmatpush1.bf16.msk.msra.mxu1 %vm827_vm3, %v517_v42 }
 0x19a   :  { %v497_v47 = vpack.c.bf16 %v132_v46, %v120_v45  ;;  %v661_v48 = vpop.permute.xlu0 %660  ;;  %v666_v49 = vpop.permute.xlu1 %665 }
 0x19b   :  { %v663_v50 = vunpack.i.h.bf16 %v661_v48  ;;  %v662_v51 = vunpack.i.l.bf16 %v661_v48  ;;  %v668_v52 = vunpack.i.h.bf16 %v666_v49  ;;  %v667_v54 = vunpack.i.l.bf16 %v666_v49 }
 0x19c   :  { %498 = vmatpush1.bf16.msk.msra.mxu0 %vm851_vm5, %v497_v47 }
 0x19d   :  { %v184_v53 = vsel %vm182_vm7, %v662_v51, %v663_v50  ;;  %v231_v1 = vsel %vm119_vm4, %v668_v52, %v653_v55  ;;  %v232_v2 = vsel %vm119_vm4, %v653_v55, %v667_v54 }
 0x19e   :  { %v500_v56 = vpack.c.bf16 %v184_v53, %v757_v30  ;;  %v671_v57 = vpop.permute.xlu0 %670  ;;  %v676_v58 = vpop.permute.xlu1 %675 }
 0x19f   :  { %v673_v60 = vunpack.i.h.bf16 %v671_v57  ;;  %v672_v61 = vunpack.i.l.bf16 %v671_v57  ;;  %v677_v63 = vunpack.i.l.bf16 %v676_v58  ;;  %v678_v9 = vunpack.i.h.bf16 %v676_v58 }
 0x1a0   :  { %501 = vmatprep.subr.msk.bf16.mxu0 %vm812_vm0, %v500_v56 }
 0x1a1   :  { %v243_v4 = vsel %vm91_vm6, %v673_v60, %v658_v59  ;;  %v244_v5 = vsel %vm91_vm6, %v658_v59, %v672_v61  ;;  %v183_v6 = vsel %vm182_vm7, %v677_v63, %v662_v51  ;;  %vm335_vm6 = vcmask 588800  }
 0x1a2   :  { %v520_v30 = vpack.c.bf16 %v244_v5, %v232_v2  ;;  %v523_v7 = vpack.c.bf16 %v243_v4, %v231_v1  ;;  %v503_v3 = vpack.c.bf16 %v183_v6, %v759_v31  ;;  %v681_v8 = vpop.permute.xlu0 %680 }
 0x1a3   :  { %v683_v10 = vunpack.i.h.bf16 %v681_v8  ;;  %v682_v11 = vunpack.i.l.bf16 %v681_v8 }
 0x1a4   :  { %504 = vmatpush1.bf16.msk.msra.mxu0 %vm812_vm0, %v503_v3  ;;  %521 = vmatprep.subr.msk.bf16.mxu1 %vm851_vm5, %v520_v30 }
 0x1a5   :  { %v291_v0 = vsel %vm182_vm7, %v683_v10, %v678_v9  ;;  %v292_v14 = vsel %vm182_vm7, %v678_v9, %v682_v11  ;;  %524 = vmatpush1.bf16.msk.msra.mxu1 %vm851_vm5, %v523_v7 }
 0x1a6   :  { %v526_v31 = vpack.c.bf16 %v292_v14, %v763_v38  ;;  %v529_v15 = vpack.c.bf16 %v291_v0, %v765_v39 }
 0x1a7   :  { %505 = vmatmul.mubr.msk.bf16.vlgmr.msra.gmra.mxu0 %vm335_vm6, %v22_v13 }
 0x1a8   :  { %527 = vmatprep.subr.msk.bf16.mxu1 %vm812_vm0, %v526_v31 }
 0x1a9   :  { %530 = vmatpush1.bf16.msk.msra.mxu1 %vm812_vm0, %v529_v15 }
 0x1ac   :  { %531 = vmatmul.mubr.msk.bf16.vlgmr.msra.gmra.mxu1 %vm335_vm6, %v22_v13 }
 0x267   :  { %v386_v16 = vpop.f32.mrf.mxu0 }
 0x268   :  { %v458_v17 = vmul.f32 %v386_v16, %v386_v16 }
 0x269   :  { %v388_v18 = vpop.f32.mrf.mxu0 }
 0x26a   :  { %v535_v19 = vpack.c.bf16 %v388_v18, %v386_v16  ;;  %v453_v20 = vadd.f32 %v388_v18, %v386_v16  ;;  %v459_v21 = vmul.f32 %v388_v18, %v388_v18 }
 0x26b   :  { %v390_v22 = vpop.f32.mrf.mxu0 }
 0x26c   :  { %442 = vst [vmem:[%s909_s4] sm:$0xff] %v535_v19  ;;  %v427_v38 = vpop.f32.mrf.mxu1  ;;  %v462_v39 = vadd.f32 %v459_v21, %v458_v17 }
 0x26d   :  { %v460_v23 = vmul.f32 %v427_v38, %v427_v38  ;;  %v391_v24 = vpop.f32.mrf.mxu0  ;;  %v454_v25 = vadd.f32 %v453_v20, %v427_v38 }
 0x26e   :  { %v429_v26 = vpop.f32.mrf.mxu1 }
 0x26f   :  { %v536_v37 = vpack.c.bf16 %v429_v26, %v427_v38  ;;  %v455_v27 = vadd.f32 %v454_v25, %v429_v26  ;;  %v461_v28 = vmul.f32 %v429_v26, %v429_v26  ;;  %v463_v29 = vadd.f32 %v462_v39, %v460_v23 }
 0x270   :  { %v431_v32 = vpop.f32.mrf.mxu1 }
 0x271   :  { %534 = vst [vmem:[%s909_s4 + $0x8] sm:$0xff] %v536_v37  ;;  %456 = vadd.xlane.f32.xlu1 %v455_v27  ;;  %v464_v33 = vadd.f32 %v463_v29, %v461_v28 }
 0x272   :  { %v432_v34 = vpop.f32.mrf.mxu1 }
 0x273   :  { %465 = vadd.xlane.f32.xlu0 %v464_v33 }
 0x2fa   :  { %v457_v35 = vpop.xlane.xlu1 %456 }
 0x2fc   :  { %v466_v36 = vpop.xlane.xlu0 %465 }
 0x2fd   :  { %v468_v40 = vsel %vm467_vm8, %v457_v35, %v466_v36 }
 0x2fe   :  { %470 = vst.msk [vmem:[%s910_s5] sm:$0xff] %vm469_vm9, %v468_v40 }

</bundles_post_ra>
